<compile_context>
chip_gen: v6e
topology: v6e:2x2x1
jax: 0.10.0
libtpu: 0.0.40
codegen_flags: <defaults>
</compile_context>

<pallas_src>
import functools

import jax
import jax.numpy as jnp
from jax.experimental import pallas as pl
from jax.experimental.pallas import tpu as pltpu


_SQRT_2_OVER_PI = 0.7978845608028654
_VMEM_CAP = 64 * 1024 * 1024          # valid on v5e / v6e / v7x
_RESIDENT_WEIGHT_BUDGET = 24 * 1024 * 1024


def _gelu_tanh(h):
    # torch.nn.GELU(approximate='tanh'), evaluated in f32 (tanh -> EUP slot).
    return 0.5 * h * (1.0 + jnp.tanh(_SQRT_2_OVER_PI * (h + 0.044715 * h * h * h)))


def mlp_kernel_resident(x_ref, wfc_ref, bfc_ref, wproj_ref, bproj_ref, o_ref):
    # x_ref:     (TM, C)  bf16   (row tile, pipelined)
    # wfc_ref:   (C, H)   bf16   bfc_ref:   (1, H) f32   (VMEM-resident)
    # wproj_ref: (H, C)   bf16   bproj_ref: (1, C) f32   (VMEM-resident)
    # o_ref:     (TM, C)  out dtype
    x = x_ref[...]
    h = jnp.dot(x, wfc_ref[...], preferred_element_type=jnp.float32) + bfc_ref[...]
    h = _gelu_tanh(h)
    out = jnp.dot(h.astype(wproj_ref.dtype), wproj_ref[...],
                  preferred_element_type=jnp.float32) + bproj_ref[...]
    o_ref[...] = out.astype(o_ref.dtype)


def mlp_kernel_htiled(x_ref, wfc_ref, bfc_ref, wproj_ref, bproj_ref, o_ref, acc_ref):
    # Grid: (row tiles, hidden tiles). Hidden axis is a reduction for the
    # second matmul -> f32 accumulator scratch, init/finalize via pl.when.
    j = pl.program_id(1)

    @pl.when(j == 0)
    def _():
        acc_ref[...] = jnp.zeros_like(acc_ref)

    x = x_ref[...]
    h = jnp.dot(x, wfc_ref[...], preferred_element_type=jnp.float32) + bfc_ref[...]
    h = _gelu_tanh(h)
    acc_ref[...] += jnp.dot(h.astype(wproj_ref.dtype), wproj_ref[...],
                            preferred_element_type=jnp.float32)

    @pl.when(j == pl.num_programs(1) - 1)
    def _():
        o_ref[...] = (acc_ref[...] + bproj_ref[...]).astype(o_ref.dtype)


def prepare_mlp_params(w_fc, b_fc, w_proj, b_proj, compute_dtype=jnp.bfloat16):
    """One-time host-side prep: transpose + cast weights, make biases 2-D.

    Shapes match torch nn.Linear:
      w_fc: [H, C] (H = 4*C), b_fc: [H], w_proj: [C, H], b_proj: [C]
    """
    wfc_t = jnp.asarray(w_fc, dtype=compute_dtype).T              # (C, H)
    wproj_t = jnp.asarray(w_proj, dtype=compute_dtype).T          # (H, C)
    bfc_2d = jnp.asarray(b_fc, dtype=jnp.float32).reshape(1, -1)      # (1, H)
    bproj_2d = jnp.asarray(b_proj, dtype=jnp.float32).reshape(1, -1)  # (1, C)
    return wfc_t, bfc_2d, wproj_t, bproj_2d


def _auto_block_h(C, H, tm, csize):
    """Largest multiple-of-128 divisor of H whose per-step tiles fit ~8 MiB."""
    budget = 8 * 1024 * 1024
    cands = [t for t in range(128, H, 128) if H % t == 0]
    for t in sorted(cands, reverse=True):
        per_step = 2 * C * t * csize + tm * t * 4   # both weight slabs + hidden
        if per_step <= budget:
            return t
    return H


@functools.partial(jax.jit, static_argnames=("block_m", "block_h"))
def mlp_pallas(x, wfc_t, bfc_2d, wproj_t, bproj_2d, block_m=256, block_h=None):
    """x: [B, T, C]; remaining params as returned by prepare_mlp_params."""
    B, T, C = x.shape
    H = wfc_t.shape[1]
    M = B * T
    compute_dtype = wfc_t.dtype
    csize = jnp.dtype(compute_dtype).itemsize
    out_dtype = x.dtype

    # Row tile: multiple of 8 (sublane), capped by (padded) M.
    tm = min(block_m, ((M + 7) // 8) * 8)
    tm = max(8, (tm // 8) * 8)
    m_pad = pl.cdiv(M, tm) * tm

    x_flat = x.reshape(M, C).astype(compute_dtype)
    if m_pad != M:
        x_flat = jnp.pad(x_flat, ((0, m_pad - M), (0, 0)))

    # Choose hidden tiling (static decision from static shapes).
    resident_bytes = 2 * C * H * csize + tm * H * 4
    if block_h is None:
        th = H if resident_bytes <= _RESIDENT_WEIGHT_BUDGET else _auto_block_h(C, H, tm, csize)
    else:
        th = block_h
    if th >= H or H % th != 0 or th % 128 != 0:
        th = H   # fall back to fully resident weights

    cost = pl.CostEstimate(
        flops=2 * 2 * m_pad * C * H,                # two matmuls
        transcendentals=m_pad * H,                  # tanh per hidden element
        bytes_accessed=(m_pad * C * csize           # x in
                        + 2 * C * H * csize         # both weights
                        + (H + C) * 4               # biases
                        + m_pad * C * 4),           # out
    )

    if th == H:
        # -------- fully weight-resident path --------
        vmem_bytes = (
            2 * tm * C * csize          # x tile (double buffered)
            + 2 * tm * C * 4            # out tile (double buffered)
            + 2 * 2 * C * H * csize     # both weights (+ buffering slack)
            + 2 * 2 * (H + C) * 4       # biases
            + 2 * tm * H * 4            # hidden intermediate + slack
        )
        vmem_limit = int(min(max(2 * vmem_bytes, 32 * 1024 * 1024), _VMEM_CAP))

        out_flat = pl.pallas_call(
            mlp_kernel_resident,
            out_shape=jax.ShapeDtypeStruct((m_pad, C), out_dtype),
            grid_spec=pltpu.PrefetchScalarGridSpec(
                num_scalar_prefetch=0,
                grid=(m_pad // tm,),
                in_specs=[
                    pl.BlockSpec((tm, C), lambda i: (i, 0)),   # x tile (pipelined)
                    pl.BlockSpec((C, H), lambda i: (0, 0)),    # W_fc^T   (resident)
                    pl.BlockSpec((1, H), lambda i: (0, 0)),    # b_fc     (resident)
                    pl.BlockSpec((H, C), lambda i: (0, 0)),    # W_proj^T (resident)
                    pl.BlockSpec((1, C), lambda i: (0, 0)),    # b_proj   (resident)
                ],
                out_specs=pl.BlockSpec((tm, C), lambda i: (i, 0)),
            ),
            compiler_params=pltpu.CompilerParams(
                dimension_semantics=("parallel",),
                vmem_limit_bytes=vmem_limit,
            ),
            cost_estimate=cost,
        )(x_flat, wfc_t, bfc_2d, wproj_t, bproj_2d)
    else:
        # -------- H-tiled accumulator path (large n_embd) --------
        vmem_bytes = (
            2 * tm * C * csize          # x tile
            + 2 * C * th * csize        # W_fc^T tile
            + 2 * th * C * csize        # W_proj^T tile
            + 2 * 2 * (th + C) * 4      # bias tiles
            + 2 * tm * C * 4            # out tile
            + tm * C * 4                # f32 accumulator scratch
            + 2 * tm * th * 4           # hidden intermediate + slack
        )
        vmem_limit = int(min(max(2 * vmem_bytes, 32 * 1024 * 1024), _VMEM_CAP))

        out_flat = pl.pallas_call(
            mlp_kernel_htiled,
            out_shape=jax.ShapeDtypeStruct((m_pad, C), out_dtype),
            grid_spec=pltpu.PrefetchScalarGridSpec(
                num_scalar_prefetch=0,
                grid=(m_pad // tm, H // th),
                in_specs=[
                    pl.BlockSpec((tm, C), lambda i, j: (i, 0)),   # x (reused over j)
                    pl.BlockSpec((C, th), lambda i, j: (0, j)),   # W_fc^T chunk
                    pl.BlockSpec((1, th), lambda i, j: (0, j)),   # b_fc   chunk
                    pl.BlockSpec((th, C), lambda i, j: (j, 0)),   # W_proj^T chunk
                    pl.BlockSpec((1, C), lambda i, j: (0, 0)),    # b_proj
                ],
                out_specs=pl.BlockSpec((tm, C), lambda i, j: (i, 0)),
                scratch_shapes=[pltpu.VMEM((tm, C), jnp.float32)],
            ),
            compiler_params=pltpu.CompilerParams(
                dimension_semantics=("parallel", "arbitrary"),
                vmem_limit_bytes=vmem_limit,
            ),
            cost_estimate=cost,
        )(x_flat, wfc_t, bfc_2d, wproj_t, bproj_2d)

    return out_flat[:M].reshape(B, T, C)


def mlp_reference(x, w_fc, b_fc, w_proj, b_proj):
    h = x @ w_fc.T + b_fc
    h = 0.5 * h * (1.0 + jnp.tanh(_SQRT_2_OVER_PI * (h + 0.044715 * h ** 3)))
    return h @ w_proj.T + b_proj


if __name__ == "__main__":
    # Small GPT-like config chosen lane-dense: n_embd=128 -> hidden=512.
    B, T, C = 2, 128, 128
    H = 4 * C

    key = jax.random.PRNGKey(0)
    kx, k1, k2, k3, k4 = jax.random.split(key, 5)

    x = jax.random.normal(kx, (B, T, C), dtype=jnp.float32)
    # Deterministic parameter init (shapes match nn.Linear in the module).
    w_fc = jax.random.normal(k1, (H, C), dtype=jnp.float32) * 0.02
    b_fc = jax.random.normal(k2, (H,), dtype=jnp.float32) * 0.02
    w_proj = jax.random.normal(k3, (C, H), dtype=jnp.float32) * 0.02
    b_proj = jax.random.normal(k4, (C,), dtype=jnp.float32) * 0.02

    # One-time parameter prep (transpose + bf16 cast) outside the per-call path.
    params = prepare_mlp_params(w_fc, b_fc, w_proj, b_proj)
    ref = mlp_reference(x, w_fc, b_fc, w_proj, b_proj)

    # Path 1: weight-resident kernel (default for small n_embd). M=256 -> grid=(2,).
    out = mlp_pallas(x, *params, block_m=128)
    out = jax.block_until_ready(out)
    assert out.shape == (B, T, C)
    err = float(jnp.max(jnp.abs(out - ref)))
    # bf16 matmul operands (f32 accumulation) -> loosened tolerance vs f32 ref.
    assert jnp.allclose(out, ref, atol=2e-2, rtol=2e-2), (
        f"resident path mismatch vs reference (max abs err {err})")

    # Path 2: H-tiled accumulator kernel (forced small block_h to exercise it).
    out2 = mlp_pallas(x, *params, block_m=128, block_h=256)   # grid=(2, 2)
    out2 = jax.block_until_ready(out2)
    err2 = float(jnp.max(jnp.abs(out2 - ref)))
    assert jnp.allclose(out2, ref, atol=2e-2, rtol=2e-2), (
        f"H-tiled path mismatch vs reference (max abs err {err2})")

    print("KERNEL_OK")
</pallas_src>

<mosaic_0001>
module attributes {stable_mosaic.version = 11 : i64} {
  func.func @mlp_kernel_resident(%arg0: i32, %arg1: memref<128x128xbf16, #tpu.memory_space<vmem>>, %arg2: memref<128x512xbf16, #tpu.memory_space<vmem>>, %arg3: memref<1x512xf32, #tpu.memory_space<vmem>>, %arg4: memref<512x128xbf16, #tpu.memory_space<vmem>>, %arg5: memref<1x128xf32, #tpu.memory_space<vmem>>, %arg6: memref<128x128xf32, #tpu.memory_space<vmem>>) attributes {dimension_semantics = [#tpu.dimension_semantics<parallel>], iteration_bounds = array<i64: 2>, scalar_prefetch = 0 : i64, scratch_operands = 0 : i64, tpu.core_type = #tpu.core_type<tc>, window_params = [{transform_indices = @transform_0, window_bounds = array<i64: 128, 128>}, {pipeline_mode = #tpu.pipeline_mode<synchronous>, transform_indices = @transform_1, window_bounds = array<i64: 128, 512>}, {pipeline_mode = #tpu.pipeline_mode<synchronous>, transform_indices = @transform_2, window_bounds = array<i64: 1, 512>}, {pipeline_mode = #tpu.pipeline_mode<synchronous>, transform_indices = @transform_3, window_bounds = array<i64: 512, 128>}, {pipeline_mode = #tpu.pipeline_mode<synchronous>, transform_indices = @transform_4, window_bounds = array<i64: 1, 128>}, {transform_indices = @transform_5, window_bounds = array<i64: 128, 128>}]} {
    %c0 = arith.constant 0 : index
    %c0_0 = arith.constant 0 : index
    %0 = vector.load %arg1[%c0, %c0_0] : memref<128x128xbf16, #tpu.memory_space<vmem>>, vector<128x128xbf16>
    %c0_1 = arith.constant 0 : index
    %c0_2 = arith.constant 0 : index
    %1 = vector.load %arg2[%c0_1, %c0_2] : memref<128x512xbf16, #tpu.memory_space<vmem>>, vector<128x512xbf16>
    %cst = arith.constant dense<0.000000e+00> : vector<128x512xf32>
    %2 = tpu.matmul %0, %1, %cst {dimension_numbers = #tpu.dot_dimension_numbers<[1], [0], [0], [1], [0, 0, 1, 1], [], []>} : vector<128x128xbf16>, vector<128x512xbf16>, vector<128x512xf32> -> vector<128x512xf32>
    %c0_3 = arith.constant 0 : index
    %c0_4 = arith.constant 0 : index
    %3 = vector.load %arg3[%c0_3, %c0_4] : memref<1x512xf32, #tpu.memory_space<vmem>>, vector<1x512xf32>
    %4 = vector.broadcast %3 : vector<1x512xf32> to vector<128x512xf32>
    %5 = arith.addf %2, %4 : vector<128x512xf32>
    %cst_5 = arith.constant 5.000000e-01 : f32
    %6 = vector.broadcast %cst_5 : f32 to vector<128x512xf32>
    %7 = arith.mulf %6, %5 : vector<128x512xf32>
    %cst_6 = arith.constant 4.471500e-02 : f32
    %8 = vector.broadcast %cst_6 : f32 to vector<128x512xf32>
    %9 = arith.mulf %8, %5 : vector<128x512xf32>
    %10 = arith.mulf %9, %5 : vector<128x512xf32>
    %11 = arith.mulf %10, %5 : vector<128x512xf32>
    %12 = arith.addf %5, %11 : vector<128x512xf32>
    %cst_7 = arith.constant 0.797884583 : f32
    %13 = vector.broadcast %cst_7 : f32 to vector<128x512xf32>
    %14 = arith.mulf %13, %12 : vector<128x512xf32>
    %15 = math.tanh %14 : vector<128x512xf32>
    %cst_8 = arith.constant 1.000000e+00 : f32
    %16 = vector.broadcast %cst_8 : f32 to vector<128x512xf32>
    %17 = arith.addf %16, %15 : vector<128x512xf32>
    %18 = arith.mulf %7, %17 : vector<128x512xf32>
    %19 = arith.truncf %18 : vector<128x512xf32> to vector<128x512xbf16>
    %c0_9 = arith.constant 0 : index
    %c0_10 = arith.constant 0 : index
    %20 = vector.load %arg4[%c0_9, %c0_10] : memref<512x128xbf16, #tpu.memory_space<vmem>>, vector<512x128xbf16>
    %cst_11 = arith.constant dense<0.000000e+00> : vector<128x128xf32>
    %21 = tpu.matmul %19, %20, %cst_11 {dimension_numbers = #tpu.dot_dimension_numbers<[1], [0], [0], [1], [0, 0, 1, 1], [], []>} : vector<128x512xbf16>, vector<512x128xbf16>, vector<128x128xf32> -> vector<128x128xf32>
    %c0_12 = arith.constant 0 : index
    %c0_13 = arith.constant 0 : index
    %22 = vector.load %arg5[%c0_12, %c0_13] : memref<1x128xf32, #tpu.memory_space<vmem>>, vector<1x128xf32>
    %23 = vector.broadcast %22 : vector<1x128xf32> to vector<128x128xf32>
    %24 = arith.addf %21, %23 : vector<128x128xf32>
    %c0_14 = arith.constant 0 : index
    %c0_15 = arith.constant 0 : index
    %25 = vector.load %arg6[%c0_14, %c0_15] : memref<128x128xf32, #tpu.memory_space<vmem>>, vector<128x128xf32>
    tpu.vector_store %arg6[%c0_14, %c0_15], %24 {strides = array<i32>} : memref<128x128xf32, #tpu.memory_space<vmem>>, vector<128x128xf32>,
    return
  }
  func.func @transform_0(%arg0: i32) -> (i32, i32) {
    %c0_i32 = arith.constant 0 : i32
    %c0_i32_0 = arith.constant 0 : i32
    return %arg0, %c0_i32 : i32, i32
  }
  func.func @transform_1(%arg0: i32) -> (i32, i32) {
    %c0_i32 = arith.constant 0 : i32
    %c0_i32_0 = arith.constant 0 : i32
    %c0_i32_1 = arith.constant 0 : i32
    return %c0_i32, %c0_i32_0 : i32, i32
  }
  func.func @transform_2(%arg0: i32) -> (i32, i32) {
    %c0_i32 = arith.constant 0 : i32
    %c0_i32_0 = arith.constant 0 : i32
    %c0_i32_1 = arith.constant 0 : i32
    return %c0_i32, %c0_i32_0 : i32, i32
  }
  func.func @transform_3(%arg0: i32) -> (i32, i32) {
    %c0_i32 = arith.constant 0 : i32
    %c0_i32_0 = arith.constant 0 : i32
    %c0_i32_1 = arith.constant 0 : i32
    return %c0_i32, %c0_i32_0 : i32, i32
  }
  func.func @transform_4(%arg0: i32) -> (i32, i32) {
    %c0_i32 = arith.constant 0 : i32
    %c0_i32_0 = arith.constant 0 : i32
    %c0_i32_1 = arith.constant 0 : i32
    return %c0_i32, %c0_i32_0 : i32, i32
  }
  func.func @transform_5(%arg0: i32) -> (i32, i32) {
    %c0_i32 = arith.constant 0 : i32
    %c0_i32_0 = arith.constant 0 : i32
    return %arg0, %c0_i32 : i32, i32
  }
}

</mosaic_0001>

<bundles_post_ra>
// kernel: mlp_pallas.1
= control target key start
LH: loop header
LB: loop body
LE: loop exit
PB: predicated region body
PF: predicated region fallthrough
CT: control target
= control target key end

     0   :  { %10 = vsyncpa [#allocation3], 0  ;;  %s3572_s0 = inlined_call_operand.vmem [shape: bf16[256,128], index: 0, kind: input, shape index: {}]   ;;  %s3573_s1 = inlined_call_operand.vmem [shape: bf16[128,512], index: 1, kind: input, shape index: {}]   ;;  %s3574_s2 = inlined_call_operand.vmem [shape: f32[1,512], index: 2, kind: input, shape index: {}]   ;;  %s3575_s3 = inlined_call_operand.hbm [shape: bf16[512,128], index: 3, kind: input, shape index: {}]   ;;  %s3576_s4 = inlined_call_operand.vmem [shape: f32[1,128], index: 4, kind: input, shape index: {}]   ;;  %s3577_s5 = inlined_call_operand.hbm [shape: f32[256,128], index: 5, kind: output, shape index: {}]  }
   0x1   :  { %11 = vsyncpa [#allocation4], 0 }
   0x2   :  { %13 = vsyncpa [#allocation4 + $0x1], 0  ;;  %s2531_s18 = smov 0   ;;  %s2533_s19 = smov 0  }
   0x3   :  { %s2535_s20 = smov 0   ;;  %s2537_s21 = smov 0  }
   0x4 LB: > { %s2552_s22 = sadd.s32 4294967295, %s2492_s21   ;;  %s1915_s23 = sadd.s32 4294967294, %s2492_s21   ;;  %s2492_s21 = sphi %s2537_s21, %s3768_s21   ;;  %s2488_s20 = sphi %s2535_s20, %s3767_s20   ;;  %s2484_s19 = sphi %s2533_s19, %s3766_s19   ;;  %s2480_s18 = sphi %s2531_s18, %s3765_s18  }
   0x5   : > { %s2556_s24 = sadd.s32 1, %s2492_s21   ;;  %s136_s25 = sadd.s32 1, %s2488_s20 }
   0x6   : > { %s133_s26 = ssub.s32 %s2492_s21, %s2556_s24  ;;  %p146_p0 = scmp.ne.s32.totalorder %s2488_s20, %s2484_s19 }
   0x7   : > { %p134_p1 = scmp.eq.s32.totalorder %s133_s26, 0  ;;  %p147_p2 = scmp.eq.s32.totalorder %s2552_s22, 1 }
   0x8   : > { %p152_p3 = scmp.ne.s32.totalorder %s2484_s19, %s2480_s18  ;;  %p153_p4 = scmp.eq.s32.totalorder %s1915_s23, 1 }
   0x9   : > { %s2567_s27 = scalar_select %p134_p1, %s2488_s20, %s136_s25  }
   0xa   : > { %p2569_p5 = por %p147_p2, %p146_p0  ;;  %p2573_p6 = por %p153_p4, %p152_p3 }
   0xb   : > { %p1916_p7 = scmp.ge.s32.totalorder %s2492_s21, 1  ;;  %p160_p8 = scmp.lt.s32.totalorder %s2492_s21, 3 }
   0xc   : > { %s3633_s29 = scalar_select %p2573_p6, 1, 0 }
   0xd   : > { %p2145_p9 = scmp.eq.s32.totalorder %s2552_s22, 0  ;;  %p2580_p10 = pnand %p1916_p7, %p160_p8 }
   0xe   : > { %s2494_s6 = smov [#allocation2]  }
   0xf   : > { %s178_s7 = sshll.u32 %s2494_s6, 4  ;;  %p2137_p11 = pneg %p2580_p10  ;;  %s179_s7 = int_to_ptr.vmem [resolvable:$true] %s178_s7 }
  0x10   : > { %s2413_s8 = scalar_lea.vmem %s179_s7, 4096  ;;  %p2421_p3 = scmp.lt.s32.totalorder %s179_s7, %s179_s7 }
  0x11   : > { %p2138_p12 = pnand %p2145_p9, %p2137_p11  ;;  %p2414_p0 = scmp.ne.s32.totalorder %s179_s7, %s2413_s8 }
  0x12   : > { %p2422_p4 = scmp.lt.s32.totalorder %s2413_s8, %s2413_s8 }
  0x13   : > { %p2404_p13 = pneg %p2138_p12 }
  0x14   : > { %p2423_p6 = por %p2422_p4, %p2421_p3 }
  0x15   : > { %p2416_p1 = pnand %p2414_p0, %p2404_p13 }
  0x17   : > { %p2417_p2 = pneg %p2416_p1 }
  0x19   : > { %p2424_p7 = pnand %p2423_p6, %p2417_p2 }
  0x1b   : > { %2427 = shalt.err (!%p2424_p7)
}
  0x1c   : > { %s2495_s9 = smov 64   ;;  %s2496_s10 = smov 4  }
  0x1d   : > { %2140 = dma.hbm_to_vmem [thread:$0]  (!%p2138_p12), %s3575_s3, 4096, %s179_s7, [#allocation3], %s2495_s9, %s2495_s9, %s2496_s10  }
  0x1e   : > { %206 = sbr.rel (%p2580_p10) target bundleno = 660 (0x294), region = 40 }
  0x23   : > { %2471 = dma.done.wait (%p2145_p9), [#allocation3], 4096  }
  0x24   : > { %2473 = vsyncadd (%p2145_p9), [#allocation3], 4294963200  ;;  %v2497_v0 = vmov 0   ;;  %v2186_v1 = vld [vmem:[%s3573_s1 + $0xe4] ss:$16 sps:$4 sm:$0xff]   ;;  %s1922_s15 = sshll.u32 %s2552_s22, 4 }
  0x25   : > { %552 = vmatprep.mubr.bf16.mxu0 %v2497_v0  ;;  %665 = vmatprep.mubr.bf16.mxu1 %v2497_v0  ;;  %v2188_v2 = vld [vmem:[%s3573_s1 + $0xec] ss:$16 sps:$4 sm:$0xff]   ;;  %v2190_v3 = vld [vmem:[%s3573_s1 + $0xe0] ss:$16 sps:$4 sm:$0xff]   ;;  %v2191_v4 = vld [vmem:[%s3573_s1 + $0xe8] ss:$16 sps:$4 sm:$0xff]  }
  0x26   : > { %520 = vmatprep.subr.bf16.mxu0 %v2186_v1  ;;  %633 = vmatprep.subr.bf16.mxu1 %v2188_v2  ;;  %v2192_v5 = vld [vmem:[%s3573_s1 + $0xc4] ss:$16 sps:$4 sm:$0xff]   ;;  %v2194_v6 = vld [vmem:[%s3573_s1 + $0xcc] ss:$16 sps:$4 sm:$0xff]   ;;  %v2196_v7 = vld [vmem:[%s3573_s1 + $0xc0] ss:$16 sps:$4 sm:$0xff]  }
  0x27   : > { %521 = vmatpush1.bf16.msra.mxu0 %v2190_v3  ;;  %634 = vmatpush1.bf16.msra.mxu1 %v2191_v4  ;;  %v2197_v8 = vld [vmem:[%s3573_s1 + $0xc8] ss:$16 sps:$4 sm:$0xff]   ;;  %v2198_v9 = vld [vmem:[%s3573_s1 + $0xa4] ss:$16 sps:$4 sm:$0xff]   ;;  %v2200_v10 = vld [vmem:[%s3573_s1 + $0xac] ss:$16 sps:$4 sm:$0xff]  }
  0x28   : > { %522 = vmatprep.subr.bf16.mxu0 %v2192_v5  ;;  %635 = vmatprep.subr.bf16.mxu1 %v2194_v6  ;;  %v2202_v11 = vld [vmem:[%s3573_s1 + $0xa0] ss:$16 sps:$4 sm:$0xff]   ;;  %v2203_v12 = vld [vmem:[%s3573_s1 + $0xa8] ss:$16 sps:$4 sm:$0xff]   ;;  %v2204_v13 = vld [vmem:[%s3573_s1 + $0x84] ss:$16 sps:$4 sm:$0xff]  }
  0x29   : > { %v2206_v14 = vld [vmem:[%s3573_s1 + $0x8c] ss:$16 sps:$4 sm:$0xff]   ;;  %p235_p6 = scmp.lt.s32.totalorder %s1922_s15, 31  ;;  %v2208_v15 = vld [vmem:[%s3573_s1 + $0x80] ss:$16 sps:$4 sm:$0xff]   ;;  %s2002_s10 = sshll.u32 %s2552_s22, 11 }
  0x2a   : > { %v2209_v16 = vld [vmem:[%s3573_s1 + $0x88] ss:$16 sps:$4 sm:$0xff]   ;;  %v2210_v17 = vld [vmem:[%s3573_s1 + $0x64] ss:$16 sps:$4 sm:$0xff]   ;;  %v2212_v18 = vld [vmem:[%s3573_s1 + $0x6c] ss:$16 sps:$4 sm:$0xff]   ;;  %s3525_s14 = scalar_lea.hbm %s3577_s5, %s2002_s10 }
  0x2b   : > { %523 = vmatpush1.bf16.msra.mxu0 %v2196_v7  ;;  %636 = vmatpush1.bf16.msra.mxu1 %v2197_v8  ;;  %s3770_s15 = smov (!%p235_p6, %s1922_s15), 31  ;;  %v2214_v19 = vld [vmem:[%s3573_s1 + $0x60] ss:$16 sps:$4 sm:$0xff]   ;;  %v2215_v20 = vld [vmem:[%s3573_s1 + $0x68] ss:$16 sps:$4 sm:$0xff]   ;;  %s2498_s17 = smov [#allocation5]  }
  0x2c   : > { %524 = vmatprep.subr.bf16.mxu0 %v2198_v9  ;;  %637 = vmatprep.subr.bf16.mxu1 %v2200_v10  ;;  %v2216_v21 = vld [vmem:[%s3573_s1 + $0x44] ss:$16 sps:$4 sm:$0xff]   ;;  %v2218_v22 = vld [vmem:[%s3573_s1 + $0x4c] ss:$16 sps:$4 sm:$0xff]   ;;  %s1923_s11 = sshll.u32 %s3770_s15, 2  ;;  %v292_v9 = vlaneseq  ;;  %s231_s15 = sand.u32 1, %s2484_s19  }
  0x2d   : > { %v2220_v23 = vld [vmem:[%s3573_s1 + $0x40] ss:$16 sps:$4 sm:$0xff]   ;;  %v2221_v24 = vld [vmem:[%s3573_s1 + $0x48] ss:$16 sps:$4 sm:$0xff]   ;;  %v2222_v25 = vld [vmem:[%s3573_s1 + $0x24] ss:$16 sps:$4 sm:$0xff]   ;;  %s2678_s30 = scalar_lea.vmem %s3572_s0, %s1923_s11 }
  0x2e   : > { %v2224_v26 = vld [vmem:[%s3573_s1 + $0x2c] ss:$16 sps:$4 sm:$0xff]   ;;  %v2226_v27 = vld [vmem:[%s3573_s1 + $0x20] ss:$16 sps:$4 sm:$0xff]   ;;  %v2227_v28 = vld [vmem:[%s3573_s1 + $0x28] ss:$16 sps:$4 sm:$0xff]  }
  0x2f   : > { %525 = vmatpush1.bf16.msra.mxu0 %v2202_v11  ;;  %638 = vmatpush1.bf16.msra.mxu1 %v2203_v12  ;;  %v2228_v29 = vld [vmem:[%s3573_s1 + $0x4] ss:$16 sps:$4 sm:$0xff]   ;;  %v2230_v30 = vld [vmem:[%s3573_s1 + $0xc] ss:$16 sps:$4 sm:$0xff]   ;;  %v2232_v31 = vld [vmem:[%s3573_s1] ss:$16 sps:$4 sm:$0xff]  }
  0x30   : > { %526 = vmatprep.subr.bf16.mxu0 %v2204_v13  ;;  %639 = vmatprep.subr.bf16.mxu1 %v2206_v14  ;;  %v2233_v32 = vld [vmem:[%s3573_s1 + $0x8] ss:$16 sps:$4 sm:$0xff]   ;;  %v2234_v33 = vld [vmem:[%s2678_s30] sm:$0xff]   ;;  %v2246_v38 = vld [vmem:[#allocation2 + $0x70] sm:$0xff]   ;;  %v293_v10 = vshrl.u32 %v292_v9, 7  ;;  %s1921_s8 = sshll.u32 %s231_s15, 7 }
  0x31   : > { %v2242_v34 = vld [vmem:[#allocation2 + $0x78] sm:$0xff]   ;;  %v2247_v39 = vld [vmem:[#allocation2 + $0x30] sm:$0xff]   ;;  %v2235_v41 = vld [vmem:[%s2678_s30 + $0x8] sm:$0xff]   ;;  %s3489_s9 = scalar_lea.vmem [#allocation5], %s1921_s8  ;;  %s3532_s22 = scalar_lea.sflag [#allocation4], %s231_s15 }
  0x32   : > { %v2243_v35 = vld [vmem:[#allocation2 + $0x38] sm:$0xff]   ;;  %v2248_v40 = vld [vmem:[#allocation2 + $0xf0] sm:$0xff]   ;;  %v2250_v43 = vld [vmem:[#allocation2 + $0x68] sm:$0xff]   ;;  %v294_v11 = vsub.s32 0, %v293_v10  ;;  %v302_v12 = vsub.s32 2, %v293_v10  ;;  %v298_v14 = vsub.s32 1, %v293_v10 }
  0x33   : > { %527 = vmatpush1.bf16.msra.mxu0 %v2208_v15  ;;  %640 = vmatpush1.bf16.msra.mxu1 %v2209_v16  ;;  %v2244_v36 = vld [vmem:[#allocation2 + $0xf8] sm:$0xff]   ;;  %v2249_v42 = vld [vmem:[#allocation2 + $0xb0] sm:$0xff]   ;;  %v2251_v44 = vld [vmem:[#allocation2 + $0x28] sm:$0xff]   ;;  %v306_v15 = vsub.s32 3, %v293_v10  ;;  %s1841_s12 = sshll.u32 %s3489_s9, 4  ;;  %s2432_s23 = sshll.u32 %s2498_s17, 4  ;;  %s3527_s12 = int_to_ptr.vmem [resolvable:$true] %s1841_s12  ;;  %s2433_s23 = int_to_ptr.vmem [resolvable:$false] %s2432_s23 }
  0x34   : > { %528 = vmatprep.subr.bf16.mxu0 %v2210_v17  ;;  %641 = vmatprep.subr.bf16.mxu1 %v2212_v18  ;;  %v2245_v37 = vld [vmem:[#allocation2 + $0xb8] sm:$0xff]   ;;  %v2252_v45 = vld [vmem:[#allocation2 + $0xe8] sm:$0xff]   ;;  %v2254_v47 = vld [vmem:[#allocation2 + $0x60] sm:$0xff]   ;;  %s2428_s16 = scalar_lea.vmem %s3527_s12, 2048  ;;  %s2434_s25 = scalar_lea.vmem %s2433_s23, 4096 }
  0x35   : > { %v2253_v46 = vld [vmem:[#allocation2 + $0xa8] sm:$0xff]   ;;  %v2236_v48 = vld [vmem:[%s2678_s30 + $0x10] sm:$0xff]   ;;  %v2237_v49 = vld [vmem:[%s2678_s30 + $0x18] sm:$0xff]   ;;  %p2429_p8 = scmp.ne.s32.totalorder %s3527_s12, %s2428_s16  ;;  %p2435_p11 = scmp.lt.s32.totalorder %s3527_s12, %s2433_s23 }
  0x36   : > { %v2238_v50 = vld [vmem:[%s2678_s30 + $0x20] sm:$0xff]   ;;  %v2239_v51 = vld [vmem:[%s2678_s30 + $0x28] sm:$0xff]   ;;  %v2240_v52 = vld [vmem:[%s2678_s30 + $0x30] sm:$0xff]   ;;  %p2436_p12 = scmp.lt.s32.totalorder %s2434_s25, %s2428_s16 }
  0x37   : > { %529 = vmatpush1.bf16.msra.mxu0 %v2214_v19  ;;  %642 = vmatpush1.bf16.msra.mxu1 %v2215_v20  ;;  %v2241_v53 = vld [vmem:[%s2678_s30 + $0x38] sm:$0xff]   ;;  %v2255_v54 = vld [vmem:[#allocation2 + $0x20] sm:$0xff]   ;;  %v2262_v61 = vld [vmem:[#allocation2 + $0x50] sm:$0xff]   ;;  %p2430_p9 = pnand %p2429_p8, %p2569_p5 }
  0x38   : > { %530 = vmatprep.subr.bf16.mxu0 %v2216_v21  ;;  %643 = vmatprep.subr.bf16.mxu1 %v2218_v22  ;;  %v2256_v55 = vld [vmem:[#allocation2 + $0xe0] sm:$0xff]   ;;  %v2258_v57 = vld [vmem:[#allocation2 + $0x58] sm:$0xff]   ;;  %v2263_v62 = vld [vmem:[#allocation2 + $0x10] sm:$0xff]   ;;  %p2437_p13 = por %p2436_p12, %p2435_p11 }
  0x39   : > { %v2257_v56 = vld [vmem:[#allocation2 + $0xa0] sm:$0xff]   ;;  %v2259_v58 = vld [vmem:[#allocation2 + $0x18] sm:$0xff]   ;;  %v2264_v63 = vld [vmem:[#allocation2 + $0xd0] sm:$0xff]   ;;  %p2431_p10 = pneg %p2430_p9 }
  0x3a   : > { %v2260_v59 = vld [vmem:[#allocation2 + $0xd8] sm:$0xff]   ;;  %v2266_v1 = vld [vmem:[#allocation2 + $0x48] sm:$0xff]   ;;  %v2270_v5 = vld [vmem:[#allocation2 + $0x40] sm:$0xff]  }
  0x3b   : > { %531 = vmatpush1.bf16.msra.mxu0 %v2220_v23  ;;  %644 = vmatpush1.bf16.msra.mxu1 %v2221_v24  ;;  %v2261_v60 = vld [vmem:[#allocation2 + $0x98] sm:$0xff]   ;;  %v2267_v2 = vld [vmem:[#allocation2 + $0x8] sm:$0xff]   ;;  %v2272_v6 = vld [vmem:[#allocation2 + $0xc0] sm:$0xff]   ;;  %p2438_p0 = pnand %p2437_p13, %p2431_p10 }
  0x3c   : > { %532 = vmatprep.subr.bf16.mxu0 %v2222_v25  ;;  %645 = vmatprep.subr.bf16.mxu1 %v2224_v26  ;;  %v2268_v3 = vld [vmem:[#allocation2 + $0xc8] sm:$0xff]   ;;  %v2271_v7 = vld [vmem:[#allocation2] sm:$0xff]  }
  0x3d   : > { %v2269_v4 = vld [vmem:[#allocation2 + $0x88] sm:$0xff]   ;;  %v2273_v8 = vld [vmem:[#allocation2 + $0x80] sm:$0xff]  }
  0x3e   : > { %v290_v13 = vld [vmem:[%s3574_s2] sm:$0xf] }
  0x3f   : > { %533 = vmatpush1.bf16.msra.mxu0 %v2226_v27  ;;  %646 = vmatpush1.bf16.msra.mxu1 %v2227_v28  ;;  %v2726_v16 = vrot.slane %v290_v13, %v294_v11  ;;  %v2728_v17 = vrot.slane %v290_v13, %v302_v12  ;;  %v2730_v20 = vrot.slane %v290_v13, %v298_v14 }
  0x40   : > { %534 = vmatprep.subr.bf16.mxu0 %v2228_v29  ;;  %647 = vmatprep.subr.bf16.mxu1 %v2230_v30  ;;  %v2732_v21 = vrot.slane %v290_v13, %v306_v15 }
  0x43   : > { %535 = vmatpush1.bf16.msra.mxu0 %v2232_v31  ;;  %648 = vmatpush1.bf16.msra.mxu1 %v2233_v32 }
  0x44   : > { %2003 = vmatprep.subr.bf16.mxu0 %v2242_v34  ;;  %2067 = vmatprep.subr.bf16.mxu1 %v2244_v36 }
  0x46   : > { %553 = vmatmul.mubr.bf16.vlgmr.msra.gmra.mxu0 %v2234_v33  ;;  %666 = vmatmul.mubr.bf16.vlgmr.msra.gmra.mxu1 %v2234_v33 }
  0x47   : > { %562 = vmatprep.mubr.bf16.mxu0 %v2497_v0  ;;  %675 = vmatprep.mubr.bf16.mxu1 %v2497_v0 }
  0x48   : > { %2004 = vmatpush3.bf16.msra.mxu0 %v2243_v35  ;;  %2068 = vmatpush3.bf16.msra.mxu1 %v2245_v37 }
  0x49   : > { %2005 = vmatprep.subr.bf16.mxu0 %v2246_v38  ;;  %2069 = vmatprep.subr.bf16.mxu1 %v2248_v40 }
  0x4c   : > { %2006 = vmatpush3.bf16.msra.mxu0 %v2247_v39  ;;  %2070 = vmatpush3.bf16.msra.mxu1 %v2249_v42 }
  0x4d   : > { %2007 = vmatprep.subr.bf16.mxu0 %v2250_v43  ;;  %2071 = vmatprep.subr.bf16.mxu1 %v2252_v45 }
  0x4e   : > { %563 = vmatmul.mubr.bf16.gmra.mxu0 %v2235_v41  ;;  %676 = vmatmul.mubr.bf16.gmra.mxu1 %v2235_v41 }
  0x4f   : > { %572 = vmatprep.mubr.bf16.mxu0 %v2497_v0  ;;  %685 = vmatprep.mubr.bf16.mxu1 %v2497_v0 }
  0x50   : > { %2008 = vmatpush3.bf16.msra.mxu0 %v2251_v44  ;;  %2072 = vmatpush3.bf16.msra.mxu1 %v2253_v46 }
  0x51   : > { %2009 = vmatprep.subr.bf16.mxu0 %v2254_v47  ;;  %2073 = vmatprep.subr.bf16.mxu1 %v2256_v55 }
  0x54   : > { %2010 = vmatpush3.bf16.msra.mxu0 %v2255_v54  ;;  %2074 = vmatpush3.bf16.msra.mxu1 %v2257_v56 }
  0x55   : > { %2011 = vmatprep.subr.bf16.mxu0 %v2258_v57  ;;  %2075 = vmatprep.subr.bf16.mxu1 %v2260_v59 }
  0x56   : > { %573 = vmatmul.mubr.bf16.gmra.mxu0 %v2236_v48  ;;  %686 = vmatmul.mubr.bf16.gmra.mxu1 %v2236_v48 }
  0x57   : > { %582 = vmatprep.mubr.bf16.mxu0 %v2497_v0  ;;  %695 = vmatprep.mubr.bf16.mxu1 %v2497_v0 }
  0x58   : > { %2012 = vmatpush3.bf16.msra.mxu0 %v2259_v58  ;;  %2076 = vmatpush3.bf16.msra.mxu1 %v2261_v60 }
  0x59   : > { %2013 = vmatprep.subr.bf16.mxu0 %v2262_v61  ;;  %2077 = vmatprep.subr.bf16.mxu1 %v2264_v63 }
  0x5c   : > { %2014 = vmatpush3.bf16.msra.mxu0 %v2263_v62 }
  0x5d   : > { %2015 = vmatprep.subr.bf16.mxu0 %v2266_v1 }
  0x5e   : > { %583 = vmatmul.mubr.bf16.gmra.mxu0 %v2237_v49  ;;  %696 = vmatmul.mubr.bf16.gmra.mxu1 %v2237_v49 }
  0x5f   : > { %592 = vmatprep.mubr.bf16.mxu0 %v2497_v0  ;;  %705 = vmatprep.mubr.bf16.mxu1 %v2497_v0 }
  0x60   : > { %2016 = vmatpush3.bf16.msra.mxu0 %v2267_v2 }
  0x61   : > { %2017 = vmatprep.subr.bf16.mxu0 %v2270_v5 }
  0x64   : > { %2018 = vmatpush3.bf16.msra.mxu0 %v2271_v7 }
  0x66   : > { %593 = vmatmul.mubr.bf16.gmra.mxu0 %v2238_v50  ;;  %706 = vmatmul.mubr.bf16.gmra.mxu1 %v2238_v50 }
  0x67   : > { %602 = vmatprep.mubr.bf16.mxu0 %v2497_v0  ;;  %715 = vmatprep.mubr.bf16.mxu1 %v2497_v0 }
  0x6e   : > { %603 = vmatmul.mubr.bf16.gmra.mxu0 %v2239_v51  ;;  %716 = vmatmul.mubr.bf16.gmra.mxu1 %v2239_v51 }
  0x6f   : > { %612 = vmatprep.mubr.bf16.mxu0 %v2497_v0  ;;  %725 = vmatprep.mubr.bf16.mxu1 %v2497_v0 }
  0x76   : > { %613 = vmatmul.mubr.bf16.gmra.mxu0 %v2240_v52  ;;  %726 = vmatmul.mubr.bf16.gmra.mxu1 %v2240_v52 }
  0x77   : > { %622 = vmatprep.mubr.bf16.mxu0 %v2497_v0  ;;  %735 = vmatprep.mubr.bf16.mxu1 %v2497_v0  ;;  %v2265_v0 = vld [vmem:[#allocation2 + $0x90] sm:$0xff]  }
  0x78   : > { %2078 = vmatpush3.bf16.msra.mxu1 %v2265_v0 }
  0x79   : > { %2079 = vmatprep.subr.bf16.mxu1 %v2268_v3 }
  0x7c   : > { %2080 = vmatpush3.bf16.msra.mxu1 %v2269_v4 }
  0x7d   : > { %2081 = vmatprep.subr.bf16.mxu1 %v2272_v6 }
  0x7e   : > { %623 = vmatmul.mubr.bf16.gmra.mxu0 %v2241_v53  ;;  %736 = vmatmul.mubr.bf16.gmra.mxu1 %v2241_v53 }
  0x80   : > { %2082 = vmatpush3.bf16.msra.mxu1 %v2273_v8 }
 0x106   : > { %v554_v18 = vpop.f32.mrf.mxu0  ;;  %v667_v19 = vpop.f32.mrf.mxu1 }
 0x107   : > { %v555_v22 = vadd.f32 %v554_v18, %v2726_v16  ;;  %v668_v23 = vadd.f32 %v667_v19, %v2728_v17 }
 0x108   : > { %v556_v24 = vpop.f32.mrf.mxu0  ;;  %v669_v25 = vpop.f32.mrf.mxu1 }
 0x109   : > { %v810_v26 = vmul.f32 0.044715, %v555_v22  ;;  %v812_v27 = vmul.f32 0.044715, %v668_v23  ;;  %v2737_v28 = vadd.f32 %v556_v24, %v2730_v20  ;;  %v2740_v29 = vadd.f32 %v669_v25, %v2732_v21 }
 0x10a   : > { %v558_v30 = vpop.f32.mrf.mxu0  ;;  %v671_v31 = vpop.f32.mrf.mxu1  ;;  %v2752_v53 = vmul.f32 0.5, %v555_v22  ;;  %v2754_v56 = vmul.f32 0.5, %v668_v23 }
 0x10b   : > { %v874_v32 = vmul.f32 %v810_v26, %v555_v22  ;;  %v876_v33 = vmul.f32 %v812_v27, %v668_v23  ;;  %v559_v34 = vadd.f32 %v558_v30, %v2726_v16  ;;  %v672_v35 = vadd.f32 %v671_v31, %v2728_v17 }
 0x10c   : > { %v560_v36 = vpop.f32.mrf.mxu0  ;;  %v673_v37 = vpop.f32.mrf.mxu1  ;;  %v811_v41 = vmul.f32 0.044715, %v2737_v28  ;;  %v813_v46 = vmul.f32 0.044715, %v2740_v29  ;;  %v2763_v1 = vmul.f32 0.5, %v2737_v28  ;;  %v2773_v7 = vmul.f32 0.5, %v2740_v29 }
 0x10d   : > { %v938_v38 = vmul.f32 %v874_v32, %v555_v22  ;;  %v940_v39 = vmul.f32 %v876_v33, %v668_v23  ;;  %v814_v40 = vmul.f32 0.044715, %v559_v34  ;;  %v816_v42 = vmul.f32 0.044715, %v672_v35 }
 0x10e   : > { %v564_v43 = vpop.f32.mrf.mxu0  ;;  %v677_v44 = vpop.f32.mrf.mxu1  ;;  %v2747_v48 = vadd.f32 %v560_v36, %v2730_v20  ;;  %v2750_v50 = vadd.f32 %v673_v37, %v2732_v21  ;;  %v875_v57 = vmul.f32 %v811_v41, %v2737_v28  ;;  %v877_v63 = vmul.f32 %v813_v46, %v2740_v29  ;;  %3636 = vst [vmem:[#allocation9_spill] sm:$0xff] %v2763_v1 }
 0x10f   : > { %v1002_v45 = vadd.f32 %v938_v38, %v555_v22  ;;  %v878_v47 = vmul.f32 %v814_v40, %v559_v34  ;;  %v880_v49 = vmul.f32 %v816_v42, %v672_v35  ;;  %v1004_v54 = vadd.f32 %v940_v39, %v668_v23  ;;  %3638 = vst [vmem:[#allocation11_spill] sm:$0xff] %v2773_v7 }
 0x110   : > { %v566_v51 = vpop.f32.mrf.mxu0  ;;  %v679_v52 = vpop.f32.mrf.mxu1  ;;  %v815_v59 = vmul.f32 0.044715, %v2747_v48  ;;  %v2760_v0 = vadd.f32 %v564_v43, %v2726_v16  ;;  %v817_v2 = vmul.f32 0.044715, %v2750_v50  ;;  %v2767_v3 = vadd.f32 %v677_v44, %v2728_v17 }
 0x111   : > { %v942_v55 = vmul.f32 %v878_v47, %v559_v34  ;;  %v944_v58 = vmul.f32 %v880_v49, %v672_v35  ;;  %v1066_v62 = vmul.f32 0.7978846, %v1002_v45  ;;  %v2770_v4 = vadd.f32 %v566_v51, %v2730_v20 }
 0x112   : > { %v568_v60 = vpop.f32.mrf.mxu0  ;;  %v681_v61 = vpop.f32.mrf.mxu1  ;;  %3635 = vst [vmem:[#allocation8_spill] sm:$0xff] %v2760_v0  ;;  %3637 = vst [vmem:[#allocation10_spill] sm:$0xff] %v2767_v3  ;;  %v1068_v8 = vmul.f32 0.7978846, %v1004_v54  ;;  %v2775_v9 = vmul.f32 0.5, %v559_v34  ;;  %v2777_v11 = vmul.f32 0.5, %v672_v35  ;;  %v2780_v12 = vmul.f32 %v875_v57, %v2737_v28 }
 0x113   : > { %v1006_v10 = vadd.f32 %v942_v55, %v559_v34  ;;  %v1008_v13 = vadd.f32 %v944_v58, %v672_v35  ;;  %v879_v14 = vmul.f32 %v815_v59, %v2747_v48  ;;  %v2784_v15 = vadd.f32 %v679_v52, %v2732_v21 }
 0x114   : > { %v570_v5 = vpop.f32.mrf.mxu0  ;;  %v683_v6 = vpop.f32.mrf.mxu1  ;;  %2274 = vtanh.f32 %v1066_v62  ;;  %v2787_v22 = vmul.f32 %v877_v63, %v2740_v29  ;;  %v818_v23 = vmul.f32 0.044715, %v2760_v0  ;;  %v2791_v24 = vadd.f32 %v568_v60, %v2726_v16 }
 0x115   : > { %3639 = vst [vmem:[#allocation12_spill] sm:$0xff] %v2784_v15  ;;  %v881_v25 = vmul.f32 %v817_v2, %v2750_v50  ;;  %v820_v26 = vmul.f32 0.044715, %v2767_v3  ;;  %v819_v27 = vmul.f32 0.044715, %v2770_v4  ;;  %v2797_v30 = vadd.f32 %v681_v61, %v2728_v17 }
 0x116   : > { %v574_v18 = vpop.f32.mrf.mxu0  ;;  %v687_v19 = vpop.f32.mrf.mxu1  ;;  %3640 = vst [vmem:[#allocation13_spill] sm:$0xff] %v2791_v24  ;;  %2276 = vtanh.f32 %v1068_v8  ;;  %v1070_v33 = vmul.f32 0.7978846, %v1006_v10  ;;  %v821_v34 = vmul.f32 0.044715, %v2784_v15  ;;  %v2801_v35 = vadd.f32 %v570_v5, %v2730_v20 }
 0x117   : > { %3641 = vst [vmem:[#allocation14_spill] sm:$0xff] %v2797_v30  ;;  %v1072_v36 = vmul.f32 0.7978846, %v1008_v13  ;;  %v2804_v37 = vmul.f32 %v879_v14, %v2747_v48  ;;  %v2807_v38 = vadd.f32 %v683_v6, %v2732_v21  ;;  %v2810_v39 = vadd.f32 %v574_v18, %v2726_v16 }
 0x118   : > { %v576_v31 = vpop.f32.mrf.mxu0  ;;  %v689_v32 = vpop.f32.mrf.mxu1  ;;  %v882_v42 = vmul.f32 %v818_v23, %v2760_v0  ;;  %v822_v43 = vmul.f32 0.044715, %v2791_v24  ;;  %v2815_v44 = vadd.f32 %v687_v19, %v2728_v17  ;;  %v2821_v46 = vmul.f32 %v881_v25, %v2750_v50 }
 0x119   : > { %3642 = vst [vmem:[#allocation15_spill] sm:$0xff] %v2807_v38  ;;  %3643 = vst [vmem:[#allocation16_spill] sm:$0xff] %v2810_v39  ;;  %v2818_v45 = vadd.f32 %v576_v31, %v2730_v20  ;;  %v884_v47 = vmul.f32 %v820_v26, %v2767_v3  ;;  %v883_v49 = vmul.f32 %v819_v27, %v2770_v4  ;;  %v824_v51 = vmul.f32 0.044715, %v2797_v30 }
 0x11a   : > { %v578_v40 = vpop.f32.mrf.mxu0  ;;  %v691_v41 = vpop.f32.mrf.mxu1  ;;  %3644 = vst [vmem:[#allocation17_spill] sm:$0xff] %v2815_v44  ;;  %2278 = vtanh.f32 %v1070_v33  ;;  %v885_v55 = vmul.f32 %v821_v34, %v2784_v15  ;;  %v823_v57 = vmul.f32 0.044715, %v2801_v35  ;;  %v825_v58 = vmul.f32 0.044715, %v2807_v38 }
 0x11b   : > { %3645 = vst [vmem:[#allocation18_spill] sm:$0xff] %v2818_v45  ;;  %2280 = vtanh.f32 %v1072_v36  ;;  %v826_v59 = vmul.f32 0.044715, %v2810_v39  ;;  %v828_v60 = vmul.f32 0.044715, %v2815_v44  ;;  %v2833_v2 = vmul.f32 %v882_v42, %v2760_v0 }
 0x11c   : > { %v580_v52 = vpop.f32.mrf.mxu0  ;;  %v693_v54 = vpop.f32.mrf.mxu1  ;;  %v827_v61 = vmul.f32 0.044715, %v2818_v45  ;;  %v886_v5 = vmul.f32 %v822_v43, %v2791_v24  ;;  %v2837_v6 = vadd.f32 %v689_v32, %v2732_v21  ;;  %v2840_v8 = vadd.f32 %v578_v40, %v2726_v16 }
 0x11d   : > { %3646 = vst [vmem:[#allocation19_spill] sm:$0xff] %v2833_v2  ;;  %v2843_v10 = vmul.f32 %v884_v47, %v2767_v3  ;;  %v2846_v13 = vmul.f32 %v883_v49, %v2770_v4  ;;  %v888_v14 = vmul.f32 %v824_v51, %v2797_v30  ;;  %v2850_v18 = vadd.f32 %v691_v41, %v2728_v17 }
 0x11e   : > { %v584_v62 = vpop.f32.mrf.mxu0  ;;  %v697_v63 = vpop.f32.mrf.mxu1  ;;  %3647 = vst [vmem:[#allocation20_spill] sm:$0xff] %v2837_v6  ;;  %v2853_v25 = vmul.f32 %v885_v55, %v2784_v15  ;;  %v887_v26 = vmul.f32 %v823_v57, %v2801_v35  ;;  %v889_v27 = vmul.f32 %v825_v58, %v2807_v38  ;;  %v2858_v31 = vadd.f32 %v580_v52, %v2730_v20 }
 0x11f   : > { %3648 = vst [vmem:[#allocation21_spill] sm:$0xff] %v2843_v10  ;;  %v890_v32 = vmul.f32 %v826_v59, %v2810_v39  ;;  %v892_v33 = vmul.f32 %v828_v60, %v2815_v44  ;;  %v891_v34 = vmul.f32 %v827_v61, %v2818_v45  ;;  %v2864_v36 = vadd.f32 %v693_v54, %v2732_v21 }
 0x120   : > { %v586_v19 = vpop.f32.mrf.mxu0  ;;  %v699_v23 = vpop.f32.mrf.mxu1  ;;  %3649 = vst [vmem:[#allocation22_spill] sm:$0xff] %v2853_v25  ;;  %v2867_v42 = vmul.f32 %v886_v5, %v2791_v24  ;;  %v829_v43 = vmul.f32 0.044715, %v2837_v6  ;;  %v830_v47 = vmul.f32 0.044715, %v2840_v8  ;;  %v2872_v49 = vadd.f32 %v584_v62, %v2726_v16 }
 0x121   : > { %v2874_v51 = vpop.eup %2274  ;;  %v2877_v52 = vmul.f32 %v888_v14, %v2797_v30  ;;  %v832_v54 = vmul.f32 0.044715, %v2850_v18  ;;  %v831_v55 = vmul.f32 0.044715, %v2858_v31  ;;  %v2882_v57 = vadd.f32 %v697_v63, %v2728_v17 }
 0x122   : > { %v588_v40 = vpop.f32.mrf.mxu0  ;;  %v701_v41 = vpop.f32.mrf.mxu1  ;;  %3650 = vst [vmem:[#allocation23_spill] sm:$0xff] %v2867_v42  ;;  %v2885_v60 = vmul.f32 %v887_v26, %v2801_v35  ;;  %v2888_v61 = vmul.f32 %v889_v27, %v2807_v38  ;;  %v833_v62 = vmul.f32 0.044715, %v2864_v36  ;;  %v2892_v5 = vadd.f32 %v586_v19, %v2730_v20 }
 0x123   : > { %3651 = vst [vmem:[#allocation24_spill] sm:$0xff] %v2877_v52  ;;  %v2894_v14 = vpop.eup %2276  ;;  %v2897_v52 = vmul.f32 %v890_v32, %v2810_v39  ;;  %v2900_v63 = vmul.f32 %v892_v33, %v2815_v44  ;;  %v2903_v30 = vmul.f32 %v891_v34, %v2818_v45  ;;  %v2906_v26 = vadd.f32 %v699_v23, %v2732_v21 }
 0x124   : > { %v590_v58 = vpop.f32.mrf.mxu0  ;;  %v703_v59 = vpop.f32.mrf.mxu1  ;;  %3652 = vst [vmem:[#allocation25_spill] sm:$0xff] %v2885_v60  ;;  %3653 = vst [vmem:[#allocation26_spill] sm:$0xff] %v2888_v61  ;;  %v893_v3 = vmul.f32 %v829_v43, %v2837_v6  ;;  %v894_v19 = vmul.f32 %v830_v47, %v2840_v8  ;;  %v834_v42 = vmul.f32 0.044715, %v2872_v49  ;;  %v2912_v32 = vadd.f32 %v588_v40, %v2726_v16 }
 0x125   : > { %3654 = vst [vmem:[#allocation27_spill] sm:$0xff] %v2897_v52  ;;  %3655 = vst [vmem:[#allocation28_spill] sm:$0xff] %v2900_v63  ;;  %v896_v33 = vmul.f32 %v832_v54, %v2850_v18  ;;  %v895_v63 = vmul.f32 %v831_v55, %v2858_v31  ;;  %v836_v34 = vmul.f32 0.044715, %v2882_v57  ;;  %v2918_v23 = vadd.f32 %v701_v41, %v2728_v17 }
 0x126   : > { %3656 = vst [vmem:[#allocation29_spill] sm:$0xff] %v2903_v30  ;;  %v594_v27 = vpop.f32.mrf.mxu0  ;;  %v707_v10 = vpop.f32.mrf.mxu1  ;;  %v897_v43 = vmul.f32 %v833_v62, %v2864_v36  ;;  %v835_v47 = vmul.f32 0.044715, %v2892_v5  ;;  %v837_v39 = vmul.f32 0.044715, %v2906_v26  ;;  %v2924_v40 = vadd.f32 %v590_v58, %v2730_v20 }
 0x127   : > { %3657 = vst [vmem:[#allocation30_spill] sm:$0xff] %v2918_v23  ;;  %v2926_v30 = vpop.eup %2278  ;;  %v838_v54 = vmul.f32 0.044715, %v2912_v32  ;;  %v840_v55 = vmul.f32 0.044715, %v2918_v23  ;;  %v2931_v41 = vadd.f32 %v703_v59, %v2732_v21  ;;  %v2934_v45 = vadd.f32 %v594_v27, %v2726_v16 }
 0x128   : > { %v596_v44 = vpop.f32.mrf.mxu0  ;;  %v709_v52 = vpop.f32.mrf.mxu1  ;;  %v898_v2 = vmul.f32 %v834_v42, %v2872_v49  ;;  %v839_v58 = vmul.f32 0.044715, %v2924_v40  ;;  %v2941_v0 = vadd.f32 %v707_v10, %v2728_v17  ;;  %v2947_v1 = vmul.f32 %v893_v3, %v2837_v6 }
 0x129   : > { %3658 = vst [vmem:[#allocation31_spill] sm:$0xff] %v2934_v45  ;;  %v2936_v24 = vpop.eup %2280  ;;  %v2944_v7 = vadd.f32 %v596_v44, %v2730_v20  ;;  %v900_v59 = vmul.f32 %v836_v34, %v2882_v57  ;;  %v841_v27 = vmul.f32 0.044715, %v2931_v41  ;;  %v842_v61 = vmul.f32 0.044715, %v2934_v45 }
 0x12a   : > { %v598_v62 = vpop.f32.mrf.mxu0  ;;  %3659 = vst [vmem:[#allocation32_spill] sm:$0xff] %v2941_v0  ;;  %3661 = vst [vmem:[#allocation34_spill] sm:$0xff] %v2947_v1  ;;  %v711_v38 = vpop.f32.mrf.mxu1  ;;  %v899_v42 = vmul.f32 %v835_v47, %v2892_v5  ;;  %v901_v25 = vmul.f32 %v837_v39, %v2906_v26  ;;  %v844_v10 = vmul.f32 0.044715, %v2941_v0  ;;  %v2957_v44 = vmul.f32 %v894_v19, %v2840_v8 }
 0x12b   : > { %3660 = vst [vmem:[#allocation33_spill] sm:$0xff] %v2944_v7  ;;  %v843_v15 = vmul.f32 0.044715, %v2944_v7  ;;  %v2960_v3 = vmul.f32 %v896_v33, %v2850_v18  ;;  %v902_v34 = vmul.f32 %v838_v54, %v2912_v32  ;;  %v904_v1 = vmul.f32 %v840_v55, %v2918_v23 }
 0x12c   : > { %3662 = vst [vmem:[#allocation35_spill] sm:$0xff] %v2957_v44  ;;  %v600_v6 = vpop.f32.mrf.mxu0  ;;  %v2965_v60 = vmul.f32 %v895_v63, %v2858_v31  ;;  %v2968_v39 = vmul.f32 %v897_v43, %v2864_v36  ;;  %v2971_v47 = vmul.f32 %v898_v2, %v2872_v49  ;;  %v903_v19 = vmul.f32 %v839_v58, %v2924_v40  ;;  %v713_v63 = vpop.f32.mrf.mxu1 }
 0x12d   : > { %3663 = vst [vmem:[#allocation36_spill] sm:$0xff] %v2960_v3  ;;  %v2975_v44 = vmul.f32 %v900_v59, %v2882_v57  ;;  %v905_v33 = vmul.f32 %v841_v27, %v2931_v41  ;;  %v906_v54 = vmul.f32 %v842_v61, %v2934_v45  ;;  %v2980_v55 = vadd.f32 %v709_v52, %v2732_v21 }
 0x12e   : > { %v2983_v3 = vmul.f32 %v899_v42, %v2892_v5  ;;  %v2986_v43 = vmul.f32 %v901_v25, %v2906_v26  ;;  %v908_v2 = vmul.f32 %v844_v10, %v2941_v0  ;;  %v907_v58 = vmul.f32 %v843_v15, %v2944_v7  ;;  %v604_v42 = vpop.f32.mrf.mxu0 }
 0x12f   : > { %3664 = vst [vmem:[#allocation37_spill] sm:$0xff] %v2975_v44  ;;  %3665 = vst [vmem:[#allocation38_spill] sm:$0xff] %v2980_v55  ;;  %v2991_v59 = vmul.f32 %v902_v34, %v2912_v32  ;;  %v2994_v27 = vmul.f32 %v904_v1, %v2918_v23  ;;  %v2997_v52 = vadd.f32 %v598_v62, %v2726_v16 }
 0x130   : > { %v3000_v61 = vadd.f32 %v711_v38, %v2728_v17  ;;  %v3003_v25 = vmul.f32 %v903_v19, %v2924_v40  ;;  %v3006_v10 = vadd.f32 %v600_v6, %v2730_v20  ;;  %v1003_v15 = vadd.f32 %v2780_v12, %v2737_v28 }
 0x131   : > { %3666 = vst [vmem:[#allocation39_spill] sm:$0xff] %v2994_v27  ;;  %3667 = vst [vmem:[#allocation40_spill] sm:$0xff] %v2997_v52  ;;  %v1007_v1 = vadd.f32 %v2804_v37, %v2747_v48  ;;  %v3013_v34 = vmul.f32 %v905_v33, %v2931_v41  ;;  %v3016_v62 = vmul.f32 %v906_v54, %v2934_v45  ;;  %v845_v38 = vmul.f32 0.044715, %v2980_v55  ;;  %v717_v27 = vpop.f32.mrf.mxu1 }
 0x132   : > { %3668 = vst [vmem:[#allocation41_spill] sm:$0xff] %v3000_v61  ;;  %v3020_v19 = vadd.f32 %v713_v63, %v2732_v21  ;;  %v3023_v6 = vmul.f32 %v908_v2, %v2941_v0  ;;  %v3026_v28 = vmul.f32 %v907_v58, %v2944_v7  ;;  %v1067_v12 = vmul.f32 0.7978846, %v1003_v15 }
 0x133   : > { %3669 = vst [vmem:[#allocation42_spill] sm:$0xff] %v3016_v62  ;;  %v1071_v37 = vmul.f32 0.7978846, %v1007_v1  ;;  %v846_v33 = vmul.f32 0.044715, %v2997_v52  ;;  %v1005_v54 = vadd.f32 %v2787_v22, %v2740_v29  ;;  %v1009_v63 = vadd.f32 %v2821_v46, %v2750_v50  ;;  %v606_v62 = vpop.f32.mrf.mxu0  ;;  %v719_v0 = vpop.f32.mrf.mxu1 }
 0x134   : > { %3670 = vst [vmem:[#allocation43_spill] sm:$0xff] %v3020_v19  ;;  %3671 = vst [vmem:[#allocation44_spill] sm:$0xff] %v3023_v6  ;;  %v848_v23 = vmul.f32 0.044715, %v3000_v61  ;;  %v847_v45 = vmul.f32 0.044715, %v3006_v10  ;;  %2282 = vtanh.f32 %v1067_v12  ;;  %v3036_v2 = vadd.f32 %v604_v42, %v2726_v16 }
 0x135   : > { %3672 = vst [vmem:[#allocation45_spill] sm:$0xff] %v3026_v28  ;;  %v3039_v58 = vadd.f32 %v717_v27, %v2728_v17  ;;  %v849_v15 = vmul.f32 0.044715, %v3020_v19  ;;  %2284 = vtanh.f32 %v1071_v37  ;;  %v1069_v1 = vmul.f32 0.7978846, %v1005_v54  ;;  %v608_v37 = vpop.f32.mrf.mxu0 }
 0x136   : > { %3673 = vst [vmem:[#allocation46_spill] sm:$0xff] %v3036_v2  ;;  %v1073_v6 = vmul.f32 0.7978846, %v1009_v63  ;;  %v909_v29 = vmul.f32 %v845_v38, %v2980_v55  ;;  %v3044_v22 = vmul.f32 0.5, %v2747_v48  ;;  %v850_v46 = vmul.f32 0.044715, %v3036_v2 }
 0x137   : > { %3674 = vst [vmem:[#allocation47_spill] sm:$0xff] %v3039_v58  ;;  %v852_v12 = vmul.f32 0.044715, %v3039_v58  ;;  %v910_v42 = vmul.f32 %v846_v33, %v2997_v52  ;;  %2286 = vtanh.f32 %v1069_v1  ;;  %v1198_v27 = vadd.f32 1.0, %v2926_v30  ;;  %v721_v30 = vpop.f32.mrf.mxu1 }
 0x138   : > { %v3051_v28 = vadd.f32 %v606_v62, %v2730_v20  ;;  %v912_v54 = vmul.f32 %v848_v23, %v3000_v61  ;;  %v911_v38 = vmul.f32 %v847_v45, %v3006_v10  ;;  %2288 = vtanh.f32 %v1073_v6 }
 0x139   : > { %v1200_v48 = vadd.f32 1.0, %v2936_v24  ;;  %v913_v63 = vmul.f32 %v849_v15, %v3020_v19  ;;  %v1194_v7 = vadd.f32 1.0, %v2874_v51  ;;  %v1196_v33 = vadd.f32 1.0, %v2894_v14 }
 0x13a   : > { %3675 = vst [vmem:[#allocation48_spill] sm:$0xff] %v3051_v28  ;;  %v851_v1 = vmul.f32 0.044715, %v3051_v28  ;;  %v914_v62 = vmul.f32 %v850_v46, %v3036_v2  ;;  %v916_v44 = vmul.f32 %v852_v12, %v3039_v58  ;;  %v3063_v23 = vadd.f32 %v719_v0, %v2732_v21 }
 0x13b   : > { %v3066_v45 = vadd.f32 %v608_v37, %v2726_v16  ;;  %v3069_v24 = vmul.f32 %v909_v29, %v2980_v55  ;;  %v3072_v51 = vmul.f32 %v910_v42, %v2997_v52  ;;  %v753_v14 = vmul.f32 0.5, %v2750_v50  ;;  %v610_v29 = vpop.f32.mrf.mxu0  ;;  %v723_v37 = vpop.f32.mrf.mxu1  ;;  %v3692_v52 = vld [vmem:[#allocation9_spill] sm:$0xff] }
 0x13c   : > { %v3076_v6 = vmul.f32 %v1198_v27, %v2775_v9  ;;  %v3079_v15 = vmul.f32 %v912_v54, %v3000_v61  ;;  %v3082_v0 = vmul.f32 %v1200_v48, %v2777_v11  ;;  %v915_v46 = vmul.f32 %v851_v1, %v3051_v28  ;;  %v3689_v61 = vld [vmem:[#allocation15_spill] sm:$0xff] }
 0x13d   : > { %3676 = vst [vmem:[#allocation49_spill] sm:$0xff] %v3066_v45  ;;  %3677 = vst [vmem:[#allocation50_spill] sm:$0xff] %v3069_v24  ;;  %v3086_v12 = vadd.f32 %v721_v30, %v2728_v17  ;;  %v3089_v42 = vmul.f32 %v911_v38, %v3006_v10  ;;  %v3092_v50 = vmul.f32 %v913_v63, %v3020_v19  ;;  %v853_v48 = vmul.f32 0.044715, %v3063_v23 }
 0x13e   : > { %3678 = vst [vmem:[#allocation51_spill] sm:$0xff] %v3072_v51  ;;  %3679 = vst [vmem:[#allocation52_spill] sm:$0xff] %v3079_v15  ;;  %v1258_v9 = vmul.f32 %v1194_v7, %v2752_v53  ;;  %v3096_v27 = vmul.f32 %v1196_v33, %v2754_v56  ;;  %v3099_v11 = vmul.f32 %v914_v62, %v3036_v2  ;;  %v854_v38 = vmul.f32 0.044715, %v3066_v45  ;;  %v3685_v56 = vld [vmem:[#allocation25_spill] sm:$0xff]  ;;  %v3687_v2 = vld [vmem:[#allocation12_spill] sm:$0xff] }
 0x13f   : > { %3680 = vst [vmem:[#allocation53_spill] sm:$0xff] %v3086_v12  ;;  %3681 = vst [vmem:[#allocation54_spill] sm:$0xff] %v3089_v42  ;;  %v3102_v54 = vmul.f32 %v916_v44, %v3039_v58  ;;  %v3108_v63 = vadd.f32 %v610_v29, %v2730_v20  ;;  %v1011_v53 = vadd.f32 %v2846_v13, %v2770_v4  ;;  %v856_v30 = vmul.f32 0.044715, %v3086_v12 }
 0x140   : > { %3682 = vst [vmem:[#allocation55_spill] sm:$0xff] %v3092_v50  ;;  %3683 = vst [vmem:[#allocation56_spill] sm:$0xff] %v3099_v11  ;;  %v1322_v1 = vpack.c.bf16 %v3076_v6, %v1258_v9  ;;  %v1015_v7 = vadd.f32 %v3685_v56, %v2801_v35  ;;  %v3117_v44 = vmul.f32 %v915_v46, %v3051_v28  ;;  %v3124_v29 = vmul.f32 0.5, %v2770_v4  ;;  %v727_v28 = vpop.f32.mrf.mxu1 }
 0x141   : > { %3684 = vst [vmem:[#allocation57_spill] sm:$0xff] %v3102_v54  ;;  %v3121_v62 = vadd.f32 %v723_v37, %v2732_v21  ;;  %v2283_v6 = vpop.eup %2282  ;;  %v3127_v13 = vmul.f32 0.5, %v2801_v35  ;;  %v1075_v9 = vmul.f32 0.7978846, %v1011_v53  ;;  %v614_v54 = vpop.f32.mrf.mxu0  ;;  %v917_v46 = vmul.f32 %v853_v48, %v3063_v23  ;;  %v3690_v35 = vld [vmem:[#allocation26_spill] sm:$0xff] }
 0x142   : > { %3686 = vst [vmem:[#allocation25_spill] sm:$0xff] %v3117_v44  ;;  %v1079_v56 = vmul.f32 0.7978846, %v1015_v7  ;;  %v2285_v58 = vpop.eup %2284  ;;  %v1195_v33 = vadd.f32 1.0, %v2283_v6  ;;  %v918_v11 = vmul.f32 %v854_v38, %v3066_v45  ;;  %v3688_v44 = vld [vmem:[#allocation22_spill] sm:$0xff]  ;;  %v1017_v51 = vadd.f32 %v3690_v35, %v3689_v61 }
 0x143   : > { %v1013_v37 = vadd.f32 %v3688_v44, %v3687_v2  ;;  %v1199_v15 = vadd.f32 1.0, %v2285_v58  ;;  %v855_v4 = vmul.f32 0.044715, %v3108_v63  ;;  %2290 = vtanh.f32 %v1075_v9  ;;  %v616_v24 = vpop.f32.mrf.mxu0 }
 0x144   : > { %v2287_v53 = vpop.eup %2286  ;;  %v857_v7 = vmul.f32 0.044715, %v3121_v62  ;;  %2292 = vtanh.f32 %v1079_v56  ;;  %v3138_v48 = vadd.f32 %v614_v54, %v2726_v16  ;;  %v1259_v50 = vmul.f32 %v1195_v33, %v3692_v52  ;;  %v729_v56 = vpop.f32.mrf.mxu1  ;;  %v3695_v52 = vld [vmem:[#allocation11_spill] sm:$0xff]  ;;  %v3696_v33 = vld [vmem:[#allocation8_spill] sm:$0xff] }
 0x145   : > { %v1077_v6 = vmul.f32 0.7978846, %v1013_v37  ;;  %v2289_v38 = vpop.eup %2288  ;;  %v1263_v44 = vmul.f32 %v1199_v15, %v3044_v22  ;;  %v1197_v58 = vadd.f32 1.0, %v2287_v53  ;;  %v1081_v19 = vmul.f32 0.7978846, %v1017_v51 }
 0x146   : > { %3691 = vst [vmem:[#allocation12_spill] sm:$0xff] %v3138_v48  ;;  %v1201_v9 = vadd.f32 1.0, %v2289_v38  ;;  %v920_v55 = vmul.f32 %v856_v30, %v3086_v12  ;;  %v3144_v35 = vadd.f32 %v727_v28, %v2728_v17  ;;  %v3147_v54 = vmul.f32 %v917_v46, %v3063_v23  ;;  %v3697_v30 = vld [vmem:[#allocation19_spill] sm:$0xff] }
 0x147   : > { %2294 = vtanh.f32 %v1077_v6  ;;  %v1323_v37 = vpack.c.bf16 %v1263_v44, %v1259_v50  ;;  %v3150_v42 = vmul.f32 0.5, %v3687_v2  ;;  %v1261_v22 = vmul.f32 %v1197_v58, %v3695_v52  ;;  %v3699_v6 = vld [vmem:[#allocation13_spill] sm:$0xff]  ;;  %v3700_v2 = vld [vmem:[#allocation23_spill] sm:$0xff] }
 0x148   : > { %3693 = vst [vmem:[#allocation22_spill] sm:$0xff] %v3144_v35  ;;  %3694 = vst [vmem:[#allocation15_spill] sm:$0xff] %v3147_v54  ;;  %2296 = vtanh.f32 %v1081_v19  ;;  %v1265_v51 = vmul.f32 %v1201_v9, %v753_v14  ;;  %v858_v15 = vmul.f32 0.044715, %v3138_v48  ;;  %v1010_v53 = vadd.f32 %v3697_v30, %v3696_v33  ;;  %v618_v19 = vpop.f32.mrf.mxu0  ;;  %v3701_v9 = vld [vmem:[#allocation10_spill] sm:$0xff]  ;;  %v3702_v52 = vld [vmem:[#allocation21_spill] sm:$0xff] }
 0x149   : > { %1649 = vmatprep.mubr.bf16.mxu0 %v1323_v37  ;;  %v3157_v28 = vmul.f32 %v918_v11, %v3066_v45  ;;  %v919_v50 = vmul.f32 %v855_v4, %v3108_v63  ;;  %v921_v46 = vmul.f32 %v857_v7, %v3121_v62  ;;  %v1014_v38 = vadd.f32 %v3700_v2, %v3699_v6  ;;  %v731_v37 = vpop.f32.mrf.mxu1  ;;  %v3703_v11 = vld [vmem:[#allocation14_spill] sm:$0xff] }
 0x14a   : > { %v1325_v44 = vpack.c.bf16 %v1265_v51, %v1261_v22  ;;  %1650 = vmatmul.mubr.bf16.vlgmr.msra.gmra.mxu0 %v1322_v1  ;;  %v860_v14 = vmul.f32 0.044715, %v3144_v35  ;;  %v1074_v58 = vmul.f32 0.7978846, %v1010_v53  ;;  %v1012_v30 = vadd.f32 %v3702_v52, %v3701_v9 }
 0x14b   : > { %3698 = vst [vmem:[#allocation26_spill] sm:$0xff] %v3157_v28  ;;  %v1078_v54 = vmul.f32 0.7978846, %v1014_v38  ;;  %v3704_v28 = vld [vmem:[#allocation24_spill] sm:$0xff]  ;;  %v3169_v4 = vadd.f32 %v616_v24, %v2730_v20  ;;  %v3172_v7 = vadd.f32 %v729_v56, %v2732_v21  ;;  %v922_v1 = vmul.f32 %v858_v15, %v3138_v48 }
 0x14c   : > { %v1016_v45 = vadd.f32 %v3704_v28, %v3703_v11  ;;  %1746 = vmatprep.mubr.bf16.mxu1 %v1325_v44  ;;  %2298 = vtanh.f32 %v1074_v58  ;;  %v1076_v22 = vmul.f32 0.7978846, %v1012_v30  ;;  %v3176_v51 = vadd.f32 %v618_v19, %v2726_v16  ;;  %v620_v19 = vpop.f32.mrf.mxu0 }
 0x14d   : > { %3705 = vst [vmem:[#allocation9_spill] sm:$0xff] %v3172_v7  ;;  %v3707_v53 = vpack.c.bf16 %v3082_v0, %v3096_v27  ;;  %v3182_v28 = vmul.f32 %v920_v55, %v3086_v12  ;;  %2300 = vtanh.f32 %v1078_v54  ;;  %v3185_v56 = vadd.f32 %v731_v37, %v2728_v17 }
 0x14e   : > { %3706 = vst [vmem:[#allocation11_spill] sm:$0xff] %v3176_v51  ;;  %v1080_v24 = vmul.f32 0.7978846, %v1016_v45  ;;  %v761_v2 = vmul.f32 0.5, %v3689_v61  ;;  %v924_v15 = vmul.f32 %v860_v14, %v3144_v35  ;;  %2302 = vtanh.f32 %v1076_v22 }
 0x14f   : > { %1747 = vmatmul.mubr.bf16.vlgmr.msra.gmra.mxu1 %v3707_v53  ;;  %3708 = vst [vmem:[#allocation8_spill] sm:$0xff] %v3182_v28  ;;  %v859_v38 = vmul.f32 0.044715, %v3169_v4  ;;  %v3191_v44 = vmul.f32 %v919_v50, %v3108_v63  ;;  %v861_v55 = vmul.f32 0.044715, %v3172_v7  ;;  %v3196_v27 = vmul.f32 %v921_v46, %v3121_v62  ;;  %v733_v50 = vpop.f32.mrf.mxu1 }
 0x150   : > { %2304 = vtanh.f32 %v1080_v24  ;;  %v862_v0 = vmul.f32 0.044715, %v3176_v51  ;;  %v2291_v45 = vpop.eup %2290  ;;  %v3199_v61 = vmul.f32 %v922_v1, %v3138_v48  ;;  %v3202_v54 = vmul.f32 0.5, %v3696_v33 }
 0x151   : > { %3709 = vst [vmem:[#allocation19_spill] sm:$0xff] %v3196_v27  ;;  %v3205_v14 = vmul.f32 0.5, %v3699_v6  ;;  %v2293_v58 = vpop.eup %2292  ;;  %v1203_v52 = vadd.f32 1.0, %v2291_v45  ;;  %v3208_v30 = vmul.f32 0.5, %v3701_v9  ;;  %v864_v37 = vmul.f32 0.044715, %v3185_v56 }
 0x152   : > { %3710 = vst [vmem:[#allocation13_spill] sm:$0xff] %v3199_v61  ;;  %v3212_v46 = vadd.f32 %v620_v19, %v2730_v20  ;;  %v1207_v22 = vadd.f32 1.0, %v2293_v58  ;;  %v3215_v1 = vmul.f32 %v924_v15, %v3144_v35  ;;  %v3218_v33 = vmul.f32 0.5, %v3703_v11  ;;  %v3712_v61 = vld [vmem:[#allocation18_spill] sm:$0xff]  ;;  %v3713_v19 = vld [vmem:[#allocation29_spill] sm:$0xff] }
 0x153   : > { %v923_v6 = vmul.f32 %v859_v38, %v3169_v4  ;;  %v925_v24 = vmul.f32 %v861_v55, %v3172_v7  ;;  %v926_v9 = vmul.f32 %v862_v0, %v3176_v51  ;;  %v3224_v45 = vadd.f32 %v733_v50, %v2732_v21  ;;  %v624_v50 = vpop.f32.mrf.mxu0 }
 0x154   : > { %3711 = vst [vmem:[#allocation23_spill] sm:$0xff] %v3215_v1  ;;  %v2295_v53 = vpop.eup %2294  ;;  %v1019_v48 = vadd.f32 %v3713_v19, %v3712_v61  ;;  %v1267_v15 = vmul.f32 %v1203_v52, %v3124_v29  ;;  %v1271_v1 = vmul.f32 %v1207_v22, %v3127_v13  ;;  %v1023_v38 = vadd.f32 %v2965_v60, %v2858_v31  ;;  %v3714_v13 = vld [vmem:[#allocation20_spill] sm:$0xff]  ;;  %v3715_v22 = vld [vmem:[#allocation34_spill] sm:$0xff] }
 0x155   : > { %v2297_v58 = vpop.eup %2296  ;;  %v1205_v11 = vadd.f32 1.0, %v2295_v53  ;;  %v928_v55 = vmul.f32 %v864_v37, %v3185_v56  ;;  %v863_v0 = vmul.f32 0.044715, %v3212_v46  ;;  %v3236_v19 = vmul.f32 0.5, %v3712_v61  ;;  %v737_v37 = vpop.f32.mrf.mxu1 }
 0x156   : > { %v1209_v35 = vadd.f32 1.0, %v2297_v58  ;;  %v1083_v28 = vmul.f32 0.7978846, %v1019_v48  ;;  %v1327_v12 = vpack.c.bf16 %v1271_v1, %v1267_v15  ;;  %v1087_v29 = vmul.f32 0.7978846, %v1023_v38  ;;  %v626_v15 = vpop.f32.mrf.mxu0  ;;  %v3718_v38 = vld [vmem:[#allocation16_spill] sm:$0xff] }
 0x157   : > { %v1269_v27 = vmul.f32 %v1205_v11, %v3150_v42  ;;  %v1021_v53 = vadd.f32 %v3715_v22, %v3714_v13  ;;  %v1025_v60 = vadd.f32 %v2968_v39, %v2864_v36  ;;  %v3243_v48 = vmul.f32 %v923_v6, %v3169_v4 }
 0x158   : > { %v1273_v52 = vmul.f32 %v1209_v35, %v761_v2  ;;  %2306 = vtanh.f32 %v1083_v28  ;;  %1657 = vmatprep.mubr.bf16.mxu0 %v1327_v12  ;;  %v865_v1 = vmul.f32 0.044715, %v3224_v45  ;;  %v3247_v42 = vadd.f32 %v624_v50, %v2726_v16 }
 0x159   : > { %2308 = vtanh.f32 %v1087_v29  ;;  %v2299_v61 = vpop.eup %2298  ;;  %v3250_v28 = vmul.f32 %v925_v24, %v3172_v7  ;;  %v1085_v2 = vmul.f32 0.7978846, %v1021_v53  ;;  %v1089_v58 = vmul.f32 0.7978846, %v1025_v60  ;;  %v3719_v29 = vld [vmem:[#allocation27_spill] sm:$0xff] }
 0x15a   : > { %v1329_v35 = vpack.c.bf16 %v1273_v52, %v1269_v27  ;;  %v2301_v39 = vpop.eup %2300  ;;  %v1202_v11 = vadd.f32 1.0, %v2299_v61  ;;  %v3253_v12 = vmul.f32 %v926_v9, %v3176_v51  ;;  %v3256_v6 = vadd.f32 %v737_v37, %v2728_v17  ;;  %v3720_v52 = vld [vmem:[#allocation35_spill] sm:$0xff] }
 0x15b   : > { %3716 = vst [vmem:[#allocation10_spill] sm:$0xff] %v3250_v28  ;;  %v1018_v50 = vadd.f32 %v3719_v29, %v3718_v38  ;;  %v2303_v22 = vpop.eup %2302  ;;  %v1206_v27 = vadd.f32 1.0, %v2301_v39  ;;  %v927_v24 = vmul.f32 %v863_v0, %v3212_v46  ;;  %2310 = vtanh.f32 %v1085_v2  ;;  %v628_v28 = vpop.f32.mrf.mxu0 }
 0x15c   : > { %3717 = vst [vmem:[#allocation21_spill] sm:$0xff] %v3253_v12  ;;  %1754 = vmatprep.mubr.bf16.mxu1 %v1329_v35  ;;  %v1022_v53 = vadd.f32 %v3720_v52, %v2840_v8  ;;  %v1204_v61 = vadd.f32 1.0, %v2303_v22  ;;  %v929_v9 = vmul.f32 %v865_v1, %v3224_v45  ;;  %2312 = vtanh.f32 %v1089_v58  ;;  %v739_v12 = vpop.f32.mrf.mxu1 }
 0x15d   : > { %v2305_v60 = vpop.eup %2304  ;;  %v866_v37 = vmul.f32 0.044715, %v3247_v42  ;;  %v1266_v51 = vmul.f32 %v1202_v11, %v3202_v54  ;;  %v1270_v29 = vmul.f32 %v1206_v27, %v3205_v14  ;;  %v1082_v39 = vmul.f32 0.7978846, %v1018_v50  ;;  %v3721_v54 = vld [vmem:[#allocation17_spill] sm:$0xff]  ;;  %v3722_v14 = vld [vmem:[#allocation28_spill] sm:$0xff] }
 0x15e   : > { %v1208_v35 = vadd.f32 1.0, %v2305_v60  ;;  %v3268_v0 = vmul.f32 %v928_v55, %v3185_v56  ;;  %v767_v2 = vmul.f32 0.5, %v2858_v31  ;;  %v868_v22 = vmul.f32 0.044715, %v3256_v6  ;;  %v3723_v50 = vld [vmem:[#allocation36_spill] sm:$0xff]  ;;  %v741_v31 = vpop.f32.mrf.mxu1 }
 0x15f   : > { %v1086_v52 = vmul.f32 0.7978846, %v1022_v53  ;;  %v1326_v1 = vpack.c.bf16 %v1270_v29, %v1266_v51  ;;  %v1268_v58 = vmul.f32 %v1204_v61, %v3208_v30  ;;  %2314 = vtanh.f32 %v1082_v39  ;;  %v630_v53 = vpop.f32.mrf.mxu0 }
 0x160   : > { %v1272_v7 = vmul.f32 %v1208_v35, %v3218_v33  ;;  %v1020_v11 = vadd.f32 %v3722_v14, %v3721_v54  ;;  %v1024_v27 = vadd.f32 %v3723_v50, %v2850_v18  ;;  %v3279_v55 = vadd.f32 %v626_v15, %v2730_v20 }
 0x161   : > { %2316 = vtanh.f32 %v1086_v52  ;;  %1658 = vmatmul.mubr.bf16.gmra.mxu0 %v1326_v1  ;;  %v3282_v51 = vmul.f32 %v927_v24, %v3212_v46  ;;  %v3285_v30 = vmul.f32 %v929_v9, %v3224_v45  ;;  %v930_v33 = vmul.f32 %v866_v37, %v3247_v42 }
 0x162   : > { %v1328_v60 = vpack.c.bf16 %v1272_v7, %v1268_v58  ;;  %v1084_v61 = vmul.f32 0.7978846, %v1020_v11  ;;  %v1088_v29 = vmul.f32 0.7978846, %v1024_v27  ;;  %v3289_v35 = vadd.f32 %v739_v12, %v2732_v21  ;;  %v743_v58 = vpop.f32.mrf.mxu1 }
 0x163   : > { %v3292_v15 = vadd.f32 %v628_v28, %v2726_v16  ;;  %v765_v7 = vmul.f32 0.5, %v3714_v13  ;;  %v932_v24 = vmul.f32 %v868_v22, %v3256_v6  ;;  %v867_v39 = vmul.f32 0.044715, %v3279_v55 }
 0x164   : > { %1755 = vmatmul.mubr.bf16.gmra.mxu1 %v1328_v60  ;;  %v3298_v9 = vadd.f32 %v741_v31, %v2728_v17  ;;  %v769_v52 = vmul.f32 0.5, %v2864_v36  ;;  %v762_v1 = vmul.f32 0.5, %v3718_v38  ;;  %2318 = vtanh.f32 %v1084_v61 }
 0x165   : > { %v2307_v37 = vpop.eup %2306  ;;  %v3303_v12 = vadd.f32 %v630_v53, %v2730_v20  ;;  %v766_v13 = vmul.f32 0.5, %v2840_v8  ;;  %v3307_v22 = vmul.f32 0.5, %v3721_v54  ;;  %2320 = vtanh.f32 %v1088_v29 }
 0x166   : > { %v2309_v16 = vpop.eup %2308  ;;  %v1211_v28 = vadd.f32 1.0, %v2307_v37  ;;  %v3310_v14 = vmul.f32 %v930_v33, %v3247_v42  ;;  %v869_v36 = vmul.f32 0.044715, %v3289_v35  ;;  %v870_v38 = vmul.f32 0.044715, %v3292_v15 }
 0x167   : > { %v1215_v17 = vadd.f32 1.0, %v2309_v16  ;;  %v3315_v20 = vmul.f32 %v932_v24, %v3256_v6  ;;  %v3318_v11 = vmul.f32 0.5, %v2850_v18  ;;  %v931_v8 = vmul.f32 %v867_v39, %v3279_v55 }
 0x168   : > { %v872_v54 = vmul.f32 0.044715, %v3298_v9  ;;  %v2311_v50 = vpop.eup %2310  ;;  %v1275_v27 = vmul.f32 %v1211_v28, %v3236_v19  ;;  %v871_v60 = vmul.f32 0.044715, %v3303_v12  ;;  %v3325_v33 = vadd.f32 %v743_v58, %v2732_v21 }
 0x169   : > { %v1279_v31 = vmul.f32 %v1215_v17, %v767_v2  ;;  %v2313_v53 = vpop.eup %2312  ;;  %v1213_v61 = vadd.f32 1.0, %v2311_v50  ;;  %v3328_v29 = vmul.f32 0.5, %v2892_v5  ;;  %v1027_v18 = vadd.f32 %v2983_v3, %v2892_v5 }
 0x16a   : > { %v1031_v24 = vadd.f32 %v3003_v25, %v2924_v40  ;;  %v1217_v37 = vadd.f32 1.0, %v2313_v53  ;;  %v933_v19 = vmul.f32 %v869_v36, %v3289_v35  ;;  %v934_v2 = vmul.f32 %v870_v38, %v3292_v15 }
 0x16b   : > { %v1331_v39 = vpack.c.bf16 %v1279_v31, %v1275_v27  ;;  %v3337_v21 = vmul.f32 %v931_v8, %v3279_v55  ;;  %v936_v16 = vmul.f32 %v872_v54, %v3298_v9  ;;  %v1091_v28 = vmul.f32 0.7978846, %v1027_v18 }
 0x16c   : > { %v1095_v58 = vmul.f32 0.7978846, %v1031_v24  ;;  %v2315_v17 = vpop.eup %2314  ;;  %v1277_v50 = vmul.f32 %v1213_v61, %v765_v7  ;;  %v1281_v5 = vmul.f32 %v1217_v37, %v769_v52  ;;  %v1029_v3 = vadd.f32 %v2986_v43, %v2906_v26 }
 0x16d   : > { %1665 = vmatprep.mubr.bf16.mxu0 %v1331_v39  ;;  %v1033_v25 = vadd.f32 %v3013_v34, %v2931_v41  ;;  %v1210_v27 = vadd.f32 1.0, %v2315_v17  ;;  %v3345_v38 = vmul.f32 %v871_v60, %v3303_v12  ;;  %2322 = vtanh.f32 %v1091_v28  ;;  %v3724_v39 = vld [vmem:[#allocation37_spill] sm:$0xff]  ;;  %v3726_v28 = vld [vmem:[#allocation39_spill] sm:$0xff] }
 0x16e   : > { %v2317_v36 = vpop.eup %2316  ;;  %v1026_v8 = vadd.f32 %v2971_v47, %v2872_v49  ;;  %v1333_v54 = vpack.c.bf16 %v1281_v5, %v1277_v50  ;;  %2324 = vtanh.f32 %v1095_v58  ;;  %v1093_v7 = vmul.f32 0.7978846, %v1029_v3 }
 0x16f   : > { %v1214_v31 = vadd.f32 1.0, %v2317_v36  ;;  %v3350_v52 = vmul.f32 %v933_v19, %v3289_v35  ;;  %v1097_v43 = vmul.f32 0.7978846, %v1033_v25  ;;  %v1030_v34 = vadd.f32 %v2991_v59, %v2912_v32  ;;  %v3725_v19 = vld [vmem:[#allocation30_spill] sm:$0xff]  ;;  %v3728_v36 = vld [vmem:[#allocation33_spill] sm:$0xff] }
 0x170   : > { %v1090_v53 = vmul.f32 0.7978846, %v1026_v8  ;;  %1762 = vmatprep.mubr.bf16.mxu1 %v1333_v54  ;;  %v1274_v61 = vmul.f32 %v1210_v27, %v762_v1  ;;  %v3355_v18 = vmul.f32 %v934_v2, %v3292_v15  ;;  %2326 = vtanh.f32 %v1093_v7  ;;  %v3729_v27 = vld [vmem:[#allocation45_spill] sm:$0xff]  ;;  %v3730_v54 = vld [vmem:[#allocation54_spill] sm:$0xff] }
 0x171   : > { %v1278_v60 = vmul.f32 %v1214_v31, %v766_v13  ;;  %v2319_v47 = vpop.eup %2318  ;;  %2328 = vtanh.f32 %v1097_v43  ;;  %v1094_v24 = vmul.f32 0.7978846, %v1030_v34  ;;  %v1028_v37 = vadd.f32 %v3724_v39, %v2882_v57 }
 0x172   : > { %v1032_v58 = vadd.f32 %v3726_v28, %v3725_v19  ;;  %v2321_v17 = vpop.eup %2320  ;;  %v1212_v59 = vadd.f32 1.0, %v2319_v47  ;;  %v3362_v5 = vmul.f32 0.044715, %v3325_v33  ;;  %2330 = vtanh.f32 %v1090_v53  ;;  %v3734_v28 = vld [vmem:[#allocation55_spill] sm:$0xff] }
 0x173   : > { %v1330_v50 = vpack.c.bf16 %v1278_v60, %v1274_v61  ;;  %v1216_v1 = vadd.f32 1.0, %v2321_v17  ;;  %2332 = vtanh.f32 %v1094_v24  ;;  %v1092_v13 = vmul.f32 0.7978846, %v1028_v37  ;;  %v3732_v60 = vld [vmem:[#allocation50_spill] sm:$0xff]  ;;  %v3733_v37 = vld [vmem:[#allocation43_spill] sm:$0xff] }
 0x174   : > { %v1096_v2 = vmul.f32 0.7978846, %v1032_v58  ;;  %v3365_v3 = vmul.f32 %v936_v16, %v3298_v9  ;;  %v775_v25 = vmul.f32 0.5, %v2924_v40  ;;  %v1035_v8 = vadd.f32 %v3729_v27, %v3728_v36  ;;  %v3731_v16 = vld [vmem:[#allocation38_spill] sm:$0xff] }
 0x175   : > { %1666 = vmatmul.mubr.bf16.gmra.mxu0 %v1330_v50  ;;  %v1039_v31 = vadd.f32 %v3730_v54, %v3006_v10  ;;  %v1276_v7 = vmul.f32 %v1212_v59, %v3307_v22  ;;  %v1280_v43 = vmul.f32 %v1216_v1, %v3318_v11  ;;  %v773_v34 = vmul.f32 0.5, %v2906_v26  ;;  %v3735_v11 = vld [vmem:[#allocation31_spill] sm:$0xff]  ;;  %v3736_v17 = vld [vmem:[#allocation42_spill] sm:$0xff]  ;;  %v3737_v50 = vld [vmem:[#allocation40_spill] sm:$0xff] }
 0x176   : > { %3727 = vst [vmem:[#allocation14_spill] sm:$0xff] %v3365_v3  ;;  %2334 = vtanh.f32 %v1092_v13  ;;  %v1099_v53 = vmul.f32 0.7978846, %v1035_v8  ;;  %v1037_v47 = vadd.f32 %v3732_v60, %v3731_v16  ;;  %v777_v24 = vmul.f32 0.5, %v2931_v41  ;;  %v3738_v59 = vld [vmem:[#allocation51_spill] sm:$0xff]  ;;  %v3739_v54 = vld [vmem:[#allocation32_spill] sm:$0xff] }
 0x177   : > { %2336 = vtanh.f32 %v1096_v2  ;;  %v1103_v61 = vmul.f32 0.7978846, %v1039_v31  ;;  %v1332_v40 = vpack.c.bf16 %v1280_v43, %v1276_v7  ;;  %v770_v39 = vmul.f32 0.5, %v2872_v49  ;;  %v3740_v31 = vld [vmem:[#allocation44_spill] sm:$0xff] }
 0x178   : > { %v1041_v58 = vadd.f32 %v3734_v28, %v3733_v37  ;;  %2338 = vtanh.f32 %v1099_v53  ;;  %v1101_v22 = vmul.f32 0.7978846, %v1037_v47  ;;  %v1034_v26 = vadd.f32 %v3736_v17, %v3735_v11  ;;  %v3741_v47 = vld [vmem:[#allocation41_spill] sm:$0xff] }
 0x179   : > { %v1038_v1 = vadd.f32 %v3738_v59, %v3737_v50  ;;  %1763 = vmatmul.mubr.bf16.gmra.mxu1 %v1332_v40  ;;  %v774_v13 = vmul.f32 0.5, %v2912_v32  ;;  %v3387_v2 = vmul.f32 0.5, %v2882_v57  ;;  %2340 = vtanh.f32 %v1103_v61  ;;  %v3742_v40 = vld [vmem:[#allocation52_spill] sm:$0xff]  ;;  %v3744_v59 = vld [vmem:[#allocation25_spill] sm:$0xff] }
 0x17a   : > { %v1105_v41 = vmul.f32 0.7978846, %v1041_v58  ;;  %v2323_v49 = vpop.eup %2322  ;;  %2342 = vtanh.f32 %v1101_v22  ;;  %v1098_v27 = vmul.f32 0.7978846, %v1034_v26  ;;  %v1036_v7 = vadd.f32 %v3740_v31, %v3739_v54  ;;  %v3743_v26 = vld [vmem:[#allocation48_spill] sm:$0xff] }
 0x17b   : > { %v1102_v8 = vmul.f32 0.7978846, %v1038_v1  ;;  %v2325_v43 = vpop.eup %2324  ;;  %v1219_v53 = vadd.f32 1.0, %v2323_v49  ;;  %v776_v60 = vmul.f32 0.5, %v3725_v19  ;;  %v1040_v32 = vadd.f32 %v3742_v40, %v3741_v47 }
 0x17c   : > { %2344 = vtanh.f32 %v1105_v41  ;;  %v1223_v28 = vadd.f32 1.0, %v2325_v43  ;;  %v779_v57 = vmul.f32 0.5, %v3728_v36  ;;  %v1100_v61 = vmul.f32 0.7978846, %v1036_v7 }
 0x17d   : > { %2346 = vtanh.f32 %v1098_v27  ;;  %v2327_v58 = vpop.eup %2326  ;;  %v1283_v22 = vmul.f32 %v1219_v53, %v3328_v29  ;;  %v1104_v17 = vmul.f32 0.7978846, %v1040_v32  ;;  %v1043_v1 = vadd.f32 %v3744_v59, %v3743_v26 }
 0x17e   : > { %2348 = vtanh.f32 %v1102_v8  ;;  %v2329_v49 = vpop.eup %2328  ;;  %v1287_v31 = vmul.f32 %v1223_v28, %v775_v25  ;;  %v1221_v19 = vadd.f32 1.0, %v2327_v58  ;;  %v1047_v41 = vadd.f32 %v3191_v44, %v3108_v63  ;;  %v3746_v58 = vld [vmem:[#allocation19_spill] sm:$0xff] }
 0x17f   : > { %2350 = vtanh.f32 %v1100_v61  ;;  %v2331_v43 = vpop.eup %2330  ;;  %v1225_v40 = vadd.f32 1.0, %v2329_v49  ;;  %v783_v36 = vmul.f32 0.5, %v3006_v10  ;;  %v1107_v27 = vmul.f32 0.7978846, %v1043_v1  ;;  %v3745_v61 = vld [vmem:[#allocation15_spill] sm:$0xff] }
 0x180   : > { %2352 = vtanh.f32 %v1104_v17  ;;  %v2333_v7 = vpop.eup %2332  ;;  %v1335_v29 = vpack.c.bf16 %v1287_v31, %v1283_v22  ;;  %v1218_v8 = vadd.f32 1.0, %v2331_v43  ;;  %v781_v53 = vmul.f32 0.5, %v3731_v16 }
 0x181   : > { %v1111_v32 = vmul.f32 0.7978846, %v1047_v41  ;;  %v1285_v59 = vmul.f32 %v1221_v19, %v773_v34  ;;  %v1289_v3 = vmul.f32 %v1225_v40, %v777_v24  ;;  %v1222_v25 = vadd.f32 1.0, %v2333_v7  ;;  %v3748_v7 = vld [vmem:[#allocation56_spill] sm:$0xff] }
 0x182   : > { %2354 = vtanh.f32 %v1107_v27  ;;  %1673 = vmatprep.mubr.bf16.mxu0 %v1335_v29  ;;  %v785_v44 = vmul.f32 0.5, %v3733_v37  ;;  %v1045_v10 = vadd.f32 %v3745_v61, %v3063_v23  ;;  %v1049_v17 = vadd.f32 %v3746_v58, %v3121_v62  ;;  %v3747_v27 = vld [vmem:[#allocation46_spill] sm:$0xff] }
 0x183   : > { %v2335_v28 = vpop.eup %2334  ;;  %2356 = vtanh.f32 %v1111_v32  ;;  %v1337_v1 = vpack.c.bf16 %v1289_v3, %v1285_v59  ;;  %v1282_v49 = vmul.f32 %v1218_v8, %v770_v39  ;;  %v1286_v16 = vmul.f32 %v1222_v25, %v774_v13  ;;  %v3749_v32 = vld [vmem:[#allocation49_spill] sm:$0xff]  ;;  %v3750_v61 = vld [vmem:[#allocation26_spill] sm:$0xff] }
 0x184   : > { %v2337_v22 = vpop.eup %2336  ;;  %v1220_v31 = vadd.f32 1.0, %v2335_v28  ;;  %v778_v24 = vmul.f32 0.5, %v3735_v11  ;;  %v1109_v19 = vmul.f32 0.7978846, %v1045_v10  ;;  %v1113_v41 = vmul.f32 0.7978846, %v1049_v17 }
 0x185   : > { %v1224_v34 = vadd.f32 1.0, %v2337_v22  ;;  %v2339_v43 = vpop.eup %2338  ;;  %1770 = vmatprep.mubr.bf16.mxu1 %v1337_v1  ;;  %v1334_v37 = vpack.c.bf16 %v1286_v16, %v1282_v49  ;;  %v782_v40 = vmul.f32 0.5, %v3737_v50  ;;  %v1042_v29 = vadd.f32 %v3748_v7, %v3747_v27 }
 0x186   : > { %v1046_v58 = vadd.f32 %v3750_v61, %v3749_v32  ;;  %v2341_v3 = vpop.eup %2340  ;;  %v1284_v39 = vmul.f32 %v1220_v31, %v3387_v2  ;;  %v1227_v8 = vadd.f32 1.0, %v2339_v43  ;;  %2358 = vtanh.f32 %v1109_v19  ;;  %v3751_v2 = vld [vmem:[#allocation47_spill] sm:$0xff] }
 0x187   : > { %v1288_v13 = vmul.f32 %v1224_v34, %v776_v60  ;;  %v2343_v11 = vpop.eup %2342  ;;  %1674 = vmatmul.mubr.bf16.gmra.mxu0 %v1334_v37  ;;  %v1231_v59 = vadd.f32 1.0, %v2341_v3  ;;  %2360 = vtanh.f32 %v1113_v41  ;;  %v1106_v25 = vmul.f32 0.7978846, %v1042_v29  ;;  %v3752_v60 = vld [vmem:[#allocation57_spill] sm:$0xff]  ;;  %v3754_v37 = vld [vmem:[#allocation8_spill] sm:$0xff] }
 0x188   : > { %v1110_v28 = vmul.f32 0.7978846, %v1046_v58  ;;  %v1291_v17 = vmul.f32 %v1227_v8, %v779_v57  ;;  %v1229_v22 = vadd.f32 1.0, %v2343_v11  ;;  %v780_v1 = vmul.f32 0.5, %v3739_v54  ;;  %v3753_v41 = vld [vmem:[#allocation53_spill] sm:$0xff] }
 0x189   : > { %v2345_v10 = vpop.eup %2344  ;;  %v1336_v50 = vpack.c.bf16 %v1288_v13, %v1284_v39  ;;  %v1295_v16 = vmul.f32 %v1231_v59, %v783_v36  ;;  %2362 = vtanh.f32 %v1106_v25  ;;  %v1044_v31 = vadd.f32 %v3752_v60, %v3751_v2 }
 0x18a   : > { %v2347_v49 = vpop.eup %2346  ;;  %v1233_v7 = vadd.f32 1.0, %v2345_v10  ;;  %v1293_v19 = vmul.f32 %v1229_v22, %v781_v53  ;;  %2364 = vtanh.f32 %v1110_v28  ;;  %v1048_v29 = vadd.f32 %v3754_v37, %v3753_v41 }
 0x18b   : > { %v2349_v34 = vpop.eup %2348  ;;  %1771 = vmatmul.mubr.bf16.gmra.mxu1 %v1336_v50  ;;  %v1226_v43 = vadd.f32 1.0, %v2347_v49  ;;  %v1339_v57 = vpack.c.bf16 %v1295_v16, %v1291_v17  ;;  %v1108_v54 = vmul.f32 0.7978846, %v1044_v31  ;;  %v784_v13 = vmul.f32 0.5, %v3741_v47  ;;  %v3755_v31 = vld [vmem:[#allocation9_spill] sm:$0xff] }
 0x18c   : > { %v2351_v61 = vpop.eup %2350  ;;  %v1297_v58 = vmul.f32 %v1233_v7, %v785_v44  ;;  %v1230_v3 = vadd.f32 1.0, %v2349_v34  ;;  %v1112_v11 = vmul.f32 0.7978846, %v1048_v29  ;;  %v999_v10 = vmul.f32 %v3345_v38, %v3303_v12  ;;  %v3756_v34 = vld [vmem:[#allocation10_spill] sm:$0xff] }
 0x18d   : > { %v2353_v39 = vpop.eup %2352  ;;  %v1290_v36 = vmul.f32 %v1226_v43, %v778_v24  ;;  %v1228_v8 = vadd.f32 1.0, %v2351_v61  ;;  %1681 = vmatprep.mubr.bf16.mxu0 %v1339_v57  ;;  %2366 = vtanh.f32 %v1108_v54  ;;  %v1051_v44 = vadd.f32 %v3243_v48, %v3169_v4  ;;  %v3757_v61 = vld [vmem:[#allocation12_spill] sm:$0xff] }
 0x18e   : > { %v1341_v59 = vpack.c.bf16 %v1297_v58, %v1293_v19  ;;  %v1294_v25 = vmul.f32 %v1230_v3, %v782_v40  ;;  %v1232_v53 = vadd.f32 1.0, %v2353_v39  ;;  %2368 = vtanh.f32 %v1112_v11 }
 0x18f   : > { %v2355_v28 = vpop.eup %2354  ;;  %v1292_v50 = vmul.f32 %v1228_v8, %v780_v1  ;;  %v1055_v49 = vadd.f32 %v3282_v51, %v3212_v46  ;;  %v787_v40 = vmul.f32 0.5, %v3743_v26  ;;  %v791_v16 = vmul.f32 0.5, %v3108_v63 }
 0x190   : > { %v2357_v17 = vpop.eup %2356  ;;  %1778 = vmatprep.mubr.bf16.mxu1 %v1341_v59  ;;  %v1338_v24 = vpack.c.bf16 %v1294_v25, %v1290_v36  ;;  %v1296_v47 = vmul.f32 %v1232_v53, %v784_v13  ;;  %v1235_v22 = vadd.f32 1.0, %v2355_v28  ;;  %v1115_v60 = vmul.f32 0.7978846, %v1051_v44  ;;  %v3759_v36 = vld [vmem:[#allocation11_spill] sm:$0xff]  ;;  %v3760_v13 = vld [vmem:[#allocation21_spill] sm:$0xff] }
 0x191   : > { %v1239_v7 = vadd.f32 1.0, %v2357_v17  ;;  %v937_v38 = vmul.f32 %v3362_v5, %v3325_v33  ;;  %v1119_v48 = vmul.f32 0.7978846, %v1055_v49  ;;  %v1053_v19 = vadd.f32 %v3756_v34, %v3755_v31  ;;  %v3758_v5 = vld [vmem:[#allocation13_spill] sm:$0xff] }
 0x192   : > { %1682 = vmatmul.mubr.bf16.gmra.mxu0 %v1338_v24  ;;  %v1340_v1 = vpack.c.bf16 %v1296_v47, %v1292_v50  ;;  %v1299_v43 = vmul.f32 %v1235_v22, %v787_v40  ;;  %2370 = vtanh.f32 %v1115_v60  ;;  %v1057_v51 = vadd.f32 %v3285_v30, %v3224_v45  ;;  %v3761_v24 = vld [vmem:[#allocation22_spill] sm:$0xff]  ;;  %v3762_v47 = vld [vmem:[#allocation23_spill] sm:$0xff] }
 0x193   : > { %v1303_v37 = vmul.f32 %v1239_v7, %v791_v16  ;;  %v2359_v26 = vpop.eup %2358  ;;  %v789_v63 = vmul.f32 0.5, %v3063_v23  ;;  %2372 = vtanh.f32 %v1119_v48  ;;  %v1117_v29 = vmul.f32 0.7978846, %v1053_v19 }
 0x194   : > { %1779 = vmatmul.mubr.bf16.gmra.mxu1 %v1340_v1  ;;  %v1050_v57 = vadd.f32 %v3758_v5, %v3757_v61  ;;  %v2361_v58 = vpop.eup %2360  ;;  %v1237_v54 = vadd.f32 1.0, %v2359_v26  ;;  %v1121_v39 = vmul.f32 0.7978846, %v1057_v51  ;;  %v1054_v8 = vadd.f32 %v3760_v13, %v3759_v36 }
 0x195   : > { %v1343_v3 = vpack.c.bf16 %v1303_v37, %v1299_v43  ;;  %v793_v11 = vmul.f32 0.5, %v3121_v62  ;;  %v1241_v59 = vadd.f32 1.0, %v2361_v58  ;;  %2374 = vtanh.f32 %v1117_v29 }
 0x196   : > { %v1114_v30 = vmul.f32 0.7978846, %v1050_v57  ;;  %v2363_v25 = vpop.eup %2362  ;;  %v1301_v23 = vmul.f32 %v1237_v54, %v789_v63  ;;  %v786_v53 = vmul.f32 0.5, %v3747_v27  ;;  %2376 = vtanh.f32 %v1121_v39 }
 0x197   : > { %1689 = vmatprep.mubr.bf16.mxu0 %v1343_v3  ;;  %v1118_v28 = vmul.f32 0.7978846, %v1054_v8  ;;  %v2365_v50 = vpop.eup %2364  ;;  %v1305_v44 = vmul.f32 %v1241_v59, %v793_v11  ;;  %v1234_v17 = vadd.f32 1.0, %v2363_v25  ;;  %v1052_v22 = vadd.f32 %v3762_v47, %v3761_v24 }
 0x198   : > { %2378 = vtanh.f32 %v1114_v30  ;;  %v790_v49 = vmul.f32 0.5, %v3749_v32  ;;  %v1238_v62 = vadd.f32 1.0, %v2365_v50  ;;  %v1056_v40 = vadd.f32 %v3268_v0, %v3185_v56 }
 0x199   : > { %2380 = vtanh.f32 %v1118_v28  ;;  %v1001_v16 = vmul.f32 %v937_v38, %v3325_v33  ;;  %v1345_v7 = vpack.c.bf16 %v1305_v44, %v1301_v23  ;;  %v1298_v27 = vmul.f32 %v1234_v17, %v786_v53 }
 0x19a   : > { %v1116_v60 = vmul.f32 0.7978846, %v1052_v22  ;;  %v2367_v1 = vpop.eup %2366  ;;  %v1302_v48 = vmul.f32 %v1238_v62, %v790_v49  ;;  %v1120_v34 = vmul.f32 0.7978846, %v1056_v40  ;;  %v1059_v19 = vadd.f32 %v3337_v21, %v3279_v55 }
 0x19b   : > { %v1063_v43 = vadd.f32 %v999_v10, %v3303_v12  ;;  %v2369_v37 = vpop.eup %2368  ;;  %1786 = vmatprep.mubr.bf16.mxu1 %v1345_v7  ;;  %v788_v32 = vmul.f32 0.5, %v3751_v2  ;;  %v792_v51 = vmul.f32 0.5, %v3753_v41  ;;  %v1236_v0 = vadd.f32 1.0, %v2367_v1 }
 0x19c   : > { %2382 = vtanh.f32 %v1116_v60  ;;  %v1342_v38 = vpack.c.bf16 %v1302_v48, %v1298_v27  ;;  %v1240_v26 = vadd.f32 1.0, %v2369_v37  ;;  %v1123_v63 = vmul.f32 0.7978846, %v1059_v19 }
 0x19d   : > { %2384 = vtanh.f32 %v1120_v34  ;;  %v795_v29 = vmul.f32 0.5, %v3169_v4  ;;  %v1127_v5 = vmul.f32 0.7978846, %v1063_v43  ;;  %v1061_v21 = vadd.f32 %v3350_v52, %v3289_v35 }
 0x19e   : > { %v1065_v10 = vadd.f32 %v1001_v16, %v3325_v33  ;;  %1690 = vmatmul.mubr.bf16.gmra.mxu0 %v1342_v38  ;;  %v1300_v57 = vmul.f32 %v1236_v0, %v788_v32  ;;  %v1304_v58 = vmul.f32 %v1240_v26, %v792_v51  ;;  %v799_v2 = vmul.f32 0.5, %v3212_v46 }
 0x19f   : > { %2386 = vtanh.f32 %v1123_v63  ;;  %v2371_v41 = vpop.eup %2370  ;;  %v1125_v3 = vmul.f32 0.7978846, %v1061_v21  ;;  %v1058_v39 = vadd.f32 %v3310_v14, %v3247_v42  ;;  %v797_v52 = vmul.f32 0.5, %v3755_v31  ;;  %v3763_v31 = vld [vmem:[#allocation14_spill] sm:$0xff] }
 0x1a0   : > { %2388 = vtanh.f32 %v1127_v5  ;;  %v1129_v54 = vmul.f32 0.7978846, %v1065_v10  ;;  %v2373_v4 = vpop.eup %2372  ;;  %v1344_v13 = vpack.c.bf16 %v1304_v58, %v1300_v57  ;;  %v1243_v8 = vadd.f32 1.0, %v2371_v41 }
 0x1a1   : > { %v1062_v11 = vadd.f32 %v3355_v18, %v3292_v15  ;;  %v1247_v59 = vadd.f32 1.0, %v2373_v4  ;;  %v801_v30 = vmul.f32 0.5, %v3224_v45  ;;  %2390 = vtanh.f32 %v1125_v3 }
 0x1a2   : > { %v1122_v46 = vmul.f32 0.7978846, %v1058_v39  ;;  %v2375_v25 = vpop.eup %2374  ;;  %1787 = vmatmul.mubr.bf16.gmra.mxu1 %v1344_v13  ;;  %v1307_v23 = vmul.f32 %v1243_v8, %v795_v29  ;;  %2392 = vtanh.f32 %v1129_v54  ;;  %v1060_v14 = vadd.f32 %v3315_v20, %v3256_v6 }
 0x1a3   : > { %v1126_v53 = vmul.f32 0.7978846, %v1062_v11  ;;  %v2377_v28 = vpop.eup %2376  ;;  %v1311_v50 = vmul.f32 %v1247_v59, %v799_v2  ;;  %v1245_v44 = vadd.f32 1.0, %v2375_v25  ;;  %v1064_v18 = vadd.f32 %v3763_v31, %v3298_v9 }
 0x1a4   : > { %2394 = vtanh.f32 %v1122_v46  ;;  %v1249_v47 = vadd.f32 1.0, %v2377_v28  ;;  %v794_v45 = vmul.f32 0.5, %v3757_v61  ;;  %v1124_v22 = vmul.f32 0.7978846, %v1060_v14 }
 0x1a5   : > { %v2379_v17 = vpop.eup %2378  ;;  %2396 = vtanh.f32 %v1126_v53  ;;  %v1347_v62 = vpack.c.bf16 %v1311_v50, %v1307_v23  ;;  %v798_v40 = vmul.f32 0.5, %v3759_v36  ;;  %v1128_v7 = vmul.f32 0.7978846, %v1064_v18 }
 0x1a6   : > { %v2381_v49 = vpop.eup %2380  ;;  %v1242_v16 = vadd.f32 1.0, %v2379_v17  ;;  %v1309_v20 = vmul.f32 %v1245_v44, %v797_v52  ;;  %v1313_v27 = vmul.f32 %v1249_v47, %v801_v30  ;;  %2398 = vtanh.f32 %v1124_v22  ;;  %v3483_v17 = vld [vmem:[%s3576_s4] ss:$0 sm:$0xff] }
 0x1a7   : > { %v1246_v60 = vadd.f32 1.0, %v2381_v49  ;;  %1697 = vmatprep.mubr.bf16.mxu0 %v1347_v62  ;;  %2400 = vtanh.f32 %v1128_v7  ;;  %v796_v32 = vmul.f32 0.5, %v3761_v24  ;;  %v800_v36 = vmul.f32 0.5, %v3185_v56 }
 0x1a8   : > { %v1349_v48 = vpack.c.bf16 %v1313_v27, %v1309_v20  ;;  %v1306_v34 = vmul.f32 %v1242_v16, %v794_v45  ;;  %v803_v5 = vmul.f32 0.5, %v3279_v55  ;;  %v807_v21 = vmul.f32 0.5, %v3303_v12 }
 0x1a9   : > { %v2383_v1 = vpop.eup %2382  ;;  %v1310_v19 = vmul.f32 %v1246_v60, %v798_v40  ;;  %v805_v56 = vmul.f32 0.5, %v3289_v35  ;;  %v809_v39 = vmul.f32 0.5, %v3325_v33  ;;  %v802_v55 = vmul.f32 0.5, %v3247_v42 }
 0x1aa   : > { %v2385_v43 = vpop.eup %2384  ;;  %v1244_v61 = vadd.f32 1.0, %v2383_v1  ;;  %1794 = vmatprep.mubr.bf16.mxu1 %v1349_v48  ;;  %v806_v59 = vmul.f32 0.5, %v3292_v15  ;;  %v804_v33 = vmul.f32 0.5, %v3256_v6  ;;  %v808_v28 = vmul.f32 0.5, %v3298_v9 }
 0x1ab   : > { %v1346_v37 = vpack.c.bf16 %v1310_v19, %v1306_v34  ;;  %v1248_v51 = vadd.f32 1.0, %v2385_v43 }
 0x1ac   : > { %v2387_v0 = vpop.eup %2386  ;;  %v1308_v26 = vmul.f32 %v1244_v61, %v796_v32 }
 0x1ad   : > { %v2389_v38 = vpop.eup %2388  ;;  %1698 = vmatmul.mubr.bf16.gmra.mxu0 %v1346_v37  ;;  %v1312_v63 = vmul.f32 %v1248_v51, %v800_v36  ;;  %v1251_v29 = vadd.f32 1.0, %v2387_v0 }
 0x1ae   : > { %v1255_v10 = vadd.f32 1.0, %v2389_v38  ;;  %v2391_v57 = vpop.eup %2390 }
 0x1af   : > { %v1348_v58 = vpack.c.bf16 %v1312_v63, %v1308_v26  ;;  %v2393_v2 = vpop.eup %2392  ;;  %v1315_v41 = vmul.f32 %v1251_v29, %v803_v5  ;;  %v1253_v24 = vadd.f32 1.0, %v2391_v57 }
 0x1b0   : > { %v1319_v3 = vmul.f32 %v1255_v10, %v807_v21  ;;  %v1257_v4 = vadd.f32 1.0, %v2393_v2 }
 0x1b1   : > { %v2395_v54 = vpop.eup %2394  ;;  %1795 = vmatmul.mubr.bf16.gmra.mxu1 %v1348_v58  ;;  %v1317_v12 = vmul.f32 %v1253_v24, %v805_v56 }
 0x1b2   : > { %v2397_v13 = vpop.eup %2396  ;;  %v1351_v8 = vpack.c.bf16 %v1319_v3, %v1315_v41  ;;  %v1250_v52 = vadd.f32 1.0, %v2395_v54  ;;  %v1321_v11 = vmul.f32 %v1257_v4, %v809_v39 }
 0x1b3   : > { %v1254_v30 = vadd.f32 1.0, %v2397_v13  ;;  %v2399_v46 = vpop.eup %2398 }
 0x1b4   : > { %1705 = vmatprep.mubr.bf16.mxu0 %v1351_v8  ;;  %v2401_v25 = vpop.eup %2400  ;;  %v1353_v23 = vpack.c.bf16 %v1321_v11, %v1317_v12  ;;  %v1314_v53 = vmul.f32 %v1250_v52, %v802_v55  ;;  %v1252_v14 = vadd.f32 1.0, %v2399_v46 }
 0x1b5   : > { %v1318_v35 = vmul.f32 %v1254_v30, %v806_v59  ;;  %v1256_v42 = vadd.f32 1.0, %v2401_v25 }
 0x1b6   : > { %1802 = vmatprep.mubr.bf16.mxu1 %v1353_v23  ;;  %v1316_v44 = vmul.f32 %v1252_v14, %v804_v33 }
 0x1b7   : > { %v1350_v50 = vpack.c.bf16 %v1318_v35, %v1314_v53  ;;  %v1320_v31 = vmul.f32 %v1256_v42, %v808_v28 }
 0x1b9   : > { %1706 = vmatmul.mubr.bf16.gmra.mxu0 %v1350_v50  ;;  %v1352_v15 = vpack.c.bf16 %v1320_v31, %v1316_v44 }
 0x1bb   : > { %1803 = vmatmul.mubr.bf16.gmra.mxu1 %v1352_v15 }
 0x20a   : > { %v2019_v18 = vpop.f32.mrf.mxu0 }
 0x20c   : > { %v2020_v47 = vpop.f32.mrf.mxu0 }
 0x20d   : > { %v2021_v45 = vadd.f32 %v2020_v47, %v2019_v18 }
 0x20e   : > { %v2022_v9 = vpop.f32.mrf.mxu0 }
 0x20f   : > { %v2083_v6 = vpop.f32.mrf.mxu1  ;;  %v1652_v22 = vadd.f32 %v2021_v45, %v3483_v17 }
 0x210   : > { %v2023_v40 = vpop.f32.mrf.mxu0 }
 0x211   : > { %v2084_v49 = vpop.f32.mrf.mxu1  ;;  %v2024_v7 = vadd.f32 %v2023_v40, %v2022_v9 }
 0x212   : > { %v2085_v62 = vadd.f32 %v2084_v49, %v2083_v6 }
 0x213   : > { %v2086_v16 = vpop.f32.mrf.mxu1  ;;  %v1655_v27 = vadd.f32 %v2024_v7, %v3483_v17 }
 0x214   : > { %v1749_v20 = vadd.f32 %v2085_v62, %v1652_v22 }
 0x215   : > { %v2087_v60 = vpop.f32.mrf.mxu1 }
 0x216   : > { %1811 = vst [vmem:[%s3489_s9] sm:$0xff] %v1749_v20  ;;  %v2088_v1 = vadd.f32 %v2087_v60, %v2086_v16 }
 0x218   : > { %v1752_v48 = vadd.f32 %v2088_v1, %v1655_v27 }
 0x21a   : > { %1812 = vst [vmem:[%s3489_s9 + $0x8] sm:$0xff] %v1752_v48 }
 0x221   : > { %v2025_v34 = vpop.f32.mrf.mxu0 }
 0x223   : > { %v2026_v43 = vpop.f32.mrf.mxu0 }
 0x224   : > { %v2089_v19 = vpop.f32.mrf.mxu1  ;;  %v2027_v61 = vadd.f32 %v2026_v43, %v2025_v34 }
 0x225   : > { %v2028_v32 = vpop.f32.mrf.mxu0 }
 0x226   : > { %v2090_v37 = vpop.f32.mrf.mxu1  ;;  %v1660_v36 = vadd.f32 %v2027_v61, %v3483_v17 }
 0x227   : > { %v2091_v51 = vadd.f32 %v2090_v37, %v2089_v19  ;;  %v2029_v38 = vpop.f32.mrf.mxu0 }
 0x228   : > { %v2092_v0 = vpop.f32.mrf.mxu1  ;;  %v2030_v63 = vadd.f32 %v2029_v38, %v2028_v32 }
 0x229   : > { %v1757_v26 = vadd.f32 %v2091_v51, %v1660_v36 }
 0x22a   : > { %v2093_v29 = vpop.f32.mrf.mxu1  ;;  %v1663_v5 = vadd.f32 %v2030_v63, %v3483_v17 }
 0x22b   : > { %1813 = vst [vmem:[%s3489_s9 + $0x10] sm:$0xff] %v1757_v26  ;;  %v2094_v21 = vadd.f32 %v2093_v29, %v2092_v0 }
 0x22d   : > { %v1760_v10 = vadd.f32 %v2094_v21, %v1663_v5 }
 0x22f   : > { %1814 = vst [vmem:[%s3489_s9 + $0x18] sm:$0xff] %v1760_v10 }
 0x235   : > { %v2031_v57 = vpop.f32.mrf.mxu0 }
 0x237   : > { %v2032_v58 = vpop.f32.mrf.mxu0 }
 0x238   : > { %v2033_v2 = vadd.f32 %v2032_v58, %v2031_v57 }
 0x239   : > { %v2034_v41 = vpop.f32.mrf.mxu0  ;;  %v2095_v3 = vpop.f32.mrf.mxu1 }
 0x23a   : > { %v1668_v24 = vadd.f32 %v2033_v2, %v3483_v17 }
 0x23b   : > { %v2035_v54 = vpop.f32.mrf.mxu0  ;;  %v2096_v56 = vpop.f32.mrf.mxu1 }
 0x23c   : > { %v2036_v39 = vadd.f32 %v2035_v54, %v2034_v41  ;;  %v2097_v4 = vadd.f32 %v2096_v56, %v2095_v3 }
 0x23d   : > { %v2098_v13 = vpop.f32.mrf.mxu1 }
 0x23e   : > { %v1765_v8 = vadd.f32 %v2097_v4, %v1668_v24  ;;  %v1671_v55 = vadd.f32 %v2036_v39, %v3483_v17 }
 0x23f   : > { %v2099_v52 = vpop.f32.mrf.mxu1 }
 0x240   : > { %1815 = vst [vmem:[%s3489_s9 + $0x20] sm:$0xff] %v1765_v8  ;;  %v2100_v12 = vadd.f32 %v2099_v52, %v2098_v13 }
 0x242   : > { %v1768_v11 = vadd.f32 %v2100_v12, %v1671_v55 }
 0x244   : > { %1816 = vst [vmem:[%s3489_s9 + $0x28] sm:$0xff] %v1768_v11 }
 0x247   : > { %v2037_v59 = vpop.f32.mrf.mxu0 }
 0x249   : > { %v2038_v30 = vpop.f32.mrf.mxu0 }
 0x24a   : > { %v2039_v25 = vadd.f32 %v2038_v30, %v2037_v59 }
 0x24b   : > { %v2101_v46 = vpop.f32.mrf.mxu1  ;;  %v2040_v23 = vpop.f32.mrf.mxu0 }
 0x24c   : > { %v1676_v53 = vadd.f32 %v2039_v25, %v3483_v17 }
 0x24d   : > { %v2102_v35 = vpop.f32.mrf.mxu1  ;;  %v2041_v33 = vpop.f32.mrf.mxu0 }
 0x24e   : > { %v2103_v14 = vadd.f32 %v2102_v35, %v2101_v46  ;;  %v2042_v42 = vadd.f32 %v2041_v33, %v2040_v23 }
 0x24f   : > { %v2104_v28 = vpop.f32.mrf.mxu1 }
 0x250   : > { %v1773_v50 = vadd.f32 %v2103_v14, %v1676_v53  ;;  %v1679_v44 = vadd.f32 %v2042_v42, %v3483_v17 }
 0x251   : > { %v2105_v31 = vpop.f32.mrf.mxu1 }
 0x252   : > { %1817 = vst [vmem:[%s3489_s9 + $0x30] sm:$0xff] %v1773_v50  ;;  %v2106_v15 = vadd.f32 %v2105_v31, %v2104_v28  ;;  %v2043_v18 = vpop.f32.mrf.mxu0 }
 0x254   : > { %v1776_v47 = vadd.f32 %v2106_v15, %v1679_v44  ;;  %v2107_v6 = vpop.f32.mrf.mxu1  ;;  %v2044_v45 = vpop.f32.mrf.mxu0 }
 0x255   : > { %v2045_v9 = vadd.f32 %v2044_v45, %v2043_v18 }
 0x256   : > { %1818 = vst [vmem:[%s3489_s9 + $0x38] sm:$0xff] %v1776_v47  ;;  %v2108_v22 = vpop.f32.mrf.mxu1  ;;  %v2046_v49 = vpop.f32.mrf.mxu0 }
 0x257   : > { %v1684_v62 = vadd.f32 %v2045_v9, %v3483_v17  ;;  %v2109_v40 = vadd.f32 %v2108_v22, %v2107_v6 }
 0x258   : > { %v2110_v16 = vpop.f32.mrf.mxu1  ;;  %v2047_v7 = vpop.f32.mrf.mxu0 }
 0x259   : > { %v1781_v20 = vadd.f32 %v2109_v40, %v1684_v62  ;;  %v2048_v27 = vadd.f32 %v2047_v7, %v2046_v49 }
 0x25a   : > { %v2111_v60 = vpop.f32.mrf.mxu1 }
 0x25b   : > { %1819 = vst [vmem:[%s3489_s9 + $0x40] sm:$0xff] %v1781_v20  ;;  %v1687_v1 = vadd.f32 %v2048_v27, %v3483_v17  ;;  %v2112_v48 = vadd.f32 %v2111_v60, %v2110_v16 }
 0x25d   : > { %v1784_v34 = vadd.f32 %v2112_v48, %v1687_v1 }
 0x25e   : > { %v2049_v19 = vpop.f32.mrf.mxu0 }
 0x25f   : > { %1820 = vst [vmem:[%s3489_s9 + $0x48] sm:$0xff] %v1784_v34 }
 0x260   : > { %v2050_v43 = vpop.f32.mrf.mxu0 }
 0x261   : > { %v2051_v61 = vadd.f32 %v2050_v43, %v2049_v19 }
 0x262   : > { %v2113_v37 = vpop.f32.mrf.mxu1  ;;  %v2052_v32 = vpop.f32.mrf.mxu0 }
 0x263   : > { %v1692_v36 = vadd.f32 %v2051_v61, %v3483_v17 }
 0x264   : > { %v2114_v51 = vpop.f32.mrf.mxu1  ;;  %v2053_v0 = vpop.f32.mrf.mxu0 }
 0x265   : > { %v2115_v38 = vadd.f32 %v2114_v51, %v2113_v37  ;;  %v2054_v26 = vadd.f32 %v2053_v0, %v2052_v32 }
 0x266   : > { %v2116_v63 = vpop.f32.mrf.mxu1 }
 0x267   : > { %v1789_v29 = vadd.f32 %v2115_v38, %v1692_v36  ;;  %v1695_v5 = vadd.f32 %v2054_v26, %v3483_v17 }
 0x268   : > { %v2117_v21 = vpop.f32.mrf.mxu1 }
 0x269   : > { %1821 = vst [vmem:[%s3489_s9 + $0x50] sm:$0xff] %v1789_v29  ;;  %v2118_v10 = vadd.f32 %v2117_v21, %v2116_v63 }
 0x26b   : > { %v1792_v57 = vadd.f32 %v2118_v10, %v1695_v5 }
 0x26d   : > { %v2055_v58 = vpop.f32.mrf.mxu0  ;;  %1822 = vst [vmem:[%s3489_s9 + $0x58] sm:$0xff] %v1792_v57 }
 0x26f   : > { %v2056_v2 = vpop.f32.mrf.mxu0 }
 0x270   : > { %v2057_v41 = vadd.f32 %v2056_v2, %v2055_v58 }
 0x271   : > { %v2119_v3 = vpop.f32.mrf.mxu1  ;;  %v2058_v24 = vpop.f32.mrf.mxu0 }
 0x272   : > { %v1700_v54 = vadd.f32 %v2057_v41, %v3483_v17 }
 0x273   : > { %v2120_v56 = vpop.f32.mrf.mxu1  ;;  %v2059_v39 = vpop.f32.mrf.mxu0 }
 0x274   : > { %v2121_v4 = vadd.f32 %v2120_v56, %v2119_v3  ;;  %v2060_v13 = vadd.f32 %v2059_v39, %v2058_v24 }
 0x275   : > { %v2122_v8 = vpop.f32.mrf.mxu1 }
 0x276   : > { %v1797_v55 = vadd.f32 %v2121_v4, %v1700_v54  ;;  %v1703_v52 = vadd.f32 %v2060_v13, %v3483_v17 }
 0x277   : > { %v2123_v12 = vpop.f32.mrf.mxu1 }
 0x278   : > { %1823 = vst [vmem:[%s3489_s9 + $0x60] sm:$0xff] %v1797_v55  ;;  %v2124_v11 = vadd.f32 %v2123_v12, %v2122_v8 }
 0x279   : > { %v2061_v59 = vpop.f32.mrf.mxu0 }
 0x27a   : > { %v1800_v30 = vadd.f32 %v2124_v11, %v1703_v52 }
 0x27b   : > { %v2062_v46 = vpop.f32.mrf.mxu0  ;;  %v2125_v25 = vpop.f32.mrf.mxu1 }
 0x27c   : > { %1824 = vst [vmem:[%s3489_s9 + $0x68] sm:$0xff] %v1800_v30  ;;  %v2063_v23 = vadd.f32 %v2062_v46, %v2061_v59 }
 0x27d   : > { %v2064_v53 = vpop.f32.mrf.mxu0  ;;  %v2126_v14 = vpop.f32.mrf.mxu1 }
 0x27e   : > { %v1708_v35 = vadd.f32 %v2063_v23, %v3483_v17  ;;  %v2127_v33 = vadd.f32 %v2126_v14, %v2125_v25 }
 0x27f   : > { %v2065_v28 = vpop.f32.mrf.mxu0  ;;  %v2128_v42 = vpop.f32.mrf.mxu1 }
 0x280   : > { %v2066_v50 = vadd.f32 %v2065_v28, %v2064_v53  ;;  %v1805_v44 = vadd.f32 %v2127_v33, %v1708_v35 }
 0x281   : > { %v2129_v15 = vpop.f32.mrf.mxu1 }
 0x282   : > { %v1711_v31 = vadd.f32 %v2066_v50, %v3483_v17  ;;  %1825 = vst [vmem:[%s3489_s9 + $0x70] sm:$0xff] %v1805_v44  ;;  %v2130_v18 = vadd.f32 %v2129_v15, %v2128_v42 }
 0x284   : > { %v1808_v47 = vadd.f32 %v2130_v18, %v1711_v31 }
 0x286   : > { %1826 = vst [vmem:[%s3489_s9 + $0x78] sm:$0xff] %v1808_v47 }
 0x287   : > { %2441 = shalt.err (!%p2438_p0)
}
 0x288   : > { %s2442_s26 = scalar_lea.hbm %s3525_s14, 2048  ;;  %s2446_s6 = scalar_lea.hbm %s3577_s5, 4096 }
 0x289   : > { %p2443_p1 = scmp.ne.s32.totalorder %s3525_s14, %s2442_s26  ;;  %p2447_p4 = scmp.lt.s32.totalorder %s3525_s14, %s3577_s5 }
 0x28a   : > { %p2448_p7 = scmp.lt.s32.totalorder %s2446_s6, %s2442_s26 }
 0x28b   : > { %p2444_p2 = pnand %p2443_p1, %p2569_p5 }
 0x28c   : > { %p2449_p6 = por %p2448_p7, %p2447_p4 }
 0x28d   : > { %p2445_p3 = pneg %p2444_p2 }
 0x28f   : > { %p2450_p8 = pnand %p2449_p6, %p2445_p3 }
 0x291   : > { %2453 = shalt.err (!%p2450_p8)
}
 0x292   : > { %s2499_s9 = smov 128   ;;  %s2500_s10 = smov 8  }
 0x293   : > { %2135 = dma.vmem_to_hbm [thread:$0]  (%p2569_p5), %s3527_s12, 2048, %s3525_s14, %s3532_s22, %s2499_s9, %s2499_s9, %s2500_s10  }
 0x294 PF: > { %p2147_p9 = scmp.ge.s32.totalorder %s2492_s21, 2  ;;  %s1856_s11 = sand.u32 1, %s2480_s18  }
 0x295   : > { %p3764_p10 = scmp.ne.s32.totalorder %s3633_s29, 0  ;;  %s1857_s13 = scalar_lea.sflag [#allocation4], %s1856_s11 }
 0x297   : > { %p2142_p11 = pnand %p2147_p9, %p3764_p10 }
 0x299   : > { %p2143_p12 = pneg %p2142_p11 }
 0x29b   : > { %2475 = dma.done.wait (%p2143_p12), %s1857_s13, 2048  }
 0x29c   : > { %2477 = vsyncadd (%p2143_p12), %s1857_s13, 4294965248  ;;  %p16_p13 = scmp.ge.s32.totalorder %s2556_s24, 4   ;;  %s3765_s18 = smov %s2484_s19 }
 0x29d   : > { %s3766_s19 = smov %s2488_s20  ;;  %s3767_s20 = smov %s2567_s27 }
 0x29e   : > { %s3768_s21 = smov %s2556_s24  ;;  %18 = sbr.rel (!%p16_p13) target bundleno = 4 (0x4), region = 80 }
 0x2a3   :  { %1862 = vsyncpa [#allocation3], 1 }
 0x2a4   :  { %1864 = vsyncpa [#allocation3 + $0x1], 1 }
 0x2a5   :  { %1865 = vsyncpa [#allocation4], 1 }
 0x2a6   :  { %1867 = vsyncpa [#allocation4 + $0x1], 1 }

</bundles_post_ra>
